<compile_context>
chip_gen: v5e
topology: v5e:2x2
jax: 0.10.0
libtpu: 0.0.40
codegen_flags: <defaults>
</compile_context>

<pallas_src>
import functools

import jax
import jax.numpy as jnp
from jax.experimental import pallas as pl
from jax.experimental.pallas import tpu as pltpu


def dwsep_kernel(x_ref, dw_ref, b1_ref, pw_ref, b2_ref, out_ref, *, width):
    # x_ref  : (1, H*W, Cin)  f32   one image per grid step, spatially flattened
    # dw_ref : (9, Cin)       f32   depthwise 3x3 weights (bn1 scale folded),
    #                               row k = (dy+1)*3 + (dx+1)
    # b1_ref : (1, Cin)       f32   bn1 shift
    # pw_ref : (Cin, Cout)    bf16  pointwise 1x1 weights (bn2 scale folded)
    # b2_ref : (1, Cout)      f32   bn2 shift
    # out_ref: (1, H*W, Cout) f32
    _, M, Cin = x_ref.shape
    H = M // width

    x = x_ref[0]                                            # (M, Cin) f32

    # Row / column index of every flattened spatial position (edge masks).
    hi = jax.lax.broadcasted_iota(jnp.int32, (H, width, Cin), 0).reshape(M, Cin)
    wi = jax.lax.broadcasted_iota(jnp.int32, (H, width, Cin), 1).reshape(M, Cin)
    h_ok = {-1: hi > 0, 0: None, 1: hi < H - 1}
    w_ok = {-1: wi > 0, 0: None, 1: wi < width - 1}

    # ---- depthwise 3x3, stride 1, zero padding 1 (VPU + XLU rolls) --------
    acc = jnp.zeros((M, Cin), jnp.float32)
    for dy in (-1, 0, 1):
        for dx in (-1, 0, 1):
            off = dy * width + dx                           # tap reads x[h+dy, w+dx]
            v = x if off == 0 else pltpu.roll(x, shift=(-off) % M, axis=0)
            mask = h_ok[dy]
            if w_ok[dx] is not None:
                mask = w_ok[dx] if mask is None else jnp.logical_and(mask, w_ok[dx])
            if mask is not None:
                v = jnp.where(mask, v, 0.0)
            k = (dy + 1) * 3 + (dx + 1)
            acc = acc + v * dw_ref[k:k + 1, :]              # (1, Cin) broadcast
    h1 = jnp.maximum(acc + b1_ref[...], 0.0)                # bn1 shift + ReLU

    # ---- pointwise 1x1 conv (MXU, bf16 operands / f32 accumulate) ---------
    h2 = jnp.dot(h1.astype(jnp.bfloat16), pw_ref[...],
                 preferred_element_type=jnp.float32)
    out_ref[0] = jnp.maximum(h2 + b2_ref[...], 0.0)         # bn2 shift + ReLU


def original_mobile_forward(x_nhwc, params):
    """x_nhwc: (N, H, W, Cin) float32.  Returns (N, H, W, Cout) float32."""
    dw9, b1, pw, b2 = params
    N, H, W, Cin = x_nhwc.shape
    Cout = pw.shape[1]
    M = H * W
    x3 = x_nhwc.reshape(N, M, Cin)          # free reshape; channels stay on lanes

    def full_spec(a):
        nd = a.ndim
        return pl.BlockSpec(a.shape, lambda n, nd=nd: (0,) * nd)

    out3 = pl.pallas_call(
        functools.partial(dwsep_kernel, width=W),
        out_shape=jax.ShapeDtypeStruct((N, M, Cout), jnp.float32),
        grid_spec=pltpu.PrefetchScalarGridSpec(
            num_scalar_prefetch=0,
            grid=(N,),
            in_specs=[pl.BlockSpec((1, M, Cin), lambda n: (n, 0, 0)),
                      full_spec(dw9), full_spec(b1),
                      full_spec(pw), full_spec(b2)],
            out_specs=pl.BlockSpec((1, M, Cout), lambda n: (n, 0, 0))),
        compiler_params=pltpu.CompilerParams(
            dimension_semantics=("parallel",),        # batch -> both TCs on v7x
            vmem_limit_bytes=32 * 1024 * 1024),       # explicit budget, v7x-safe
    )(x3, dw9, b1, pw, b2)

    return out3.reshape(N, H, W, Cout)


def init_params(key, inp, oup, eps=1e-5):
    """Deterministic synthetic parameters; eval-mode BN folded to scale/shift."""
    ks = jax.random.split(key, 10)
    # PyTorch layouts: depthwise Conv2d(inp, inp, 3, groups=inp) weight (inp,1,3,3);
    # pointwise Conv2d(inp, oup, 1) weight (oup, inp, 1, 1).
    w_dw = 0.1 * jax.random.normal(ks[0], (inp, 1, 3, 3), jnp.float32)
    w_pw = 0.1 * jax.random.normal(ks[1], (oup, inp, 1, 1), jnp.float32)

    def bn_fold(kg, kb, km, kv, c):
        gamma = 1.0 + 0.1 * jax.random.normal(kg, (c,), jnp.float32)
        beta = 0.1 * jax.random.normal(kb, (c,), jnp.float32)
        mean = 0.1 * jax.random.normal(km, (c,), jnp.float32)
        var = jnp.abs(jax.random.normal(kv, (c,), jnp.float32)) + 0.5
        scale = gamma / jnp.sqrt(var + eps)
        shift = beta - mean * scale
        return scale, shift

    s1, b1 = bn_fold(ks[2], ks[3], ks[4], ks[5], inp)
    s2, b2 = bn_fold(ks[6], ks[7], ks[8], ks[9], oup)

    # Kernel-ready params: BN scales folded into conv weights (host-side, one-time).
    dw9 = (jnp.transpose(w_dw[:, 0, :, :], (1, 2, 0)).reshape(9, inp)
           * s1[None, :]).astype(jnp.float32)                       # (9, Cin), f32 VPU path
    pw = (jnp.transpose(w_pw[:, :, 0, 0]) * s2[None, :]).astype(jnp.bfloat16)  # (Cin, Cout)
    kernel_params = (dw9, b1.reshape(1, inp), pw, b2.reshape(1, oup))
    ref_params = (w_dw, w_pw, s1, b1, s2, b2)
    return kernel_params, ref_params


def reference_forward(x_nhwc, ref_params):
    """Plain-JAX NHWC reference mirroring the PyTorch forward (eval-mode BN)."""
    w_dw, w_pw, s1, b1, s2, b2 = ref_params
    cin = w_dw.shape[0]

    h = jax.lax.conv_general_dilated(
        x_nhwc, jnp.transpose(w_dw, (2, 3, 1, 0)),            # (3,3,1,Cin) HWIO
        window_strides=(1, 1), padding=[(1, 1), (1, 1)],
        dimension_numbers=("NHWC", "HWIO", "NHWC"),
        feature_group_count=cin)
    h = jnp.maximum(h * s1 + b1, 0.0)

    h = jax.lax.conv_general_dilated(
        h, jnp.transpose(w_pw, (2, 3, 1, 0)),                 # (1,1,Cin,Cout) HWIO
        window_strides=(1, 1), padding=[(0, 0), (0, 0)],
        dimension_numbers=("NHWC", "HWIO", "NHWC"))
    return jnp.maximum(h * s2 + b2, 0.0)


if __name__ == "__main__":
    inp, oup, stride = 64, 128, 1   # OriginalMobile(inp, oup, stride); stride unused by forward
    batch, spatial = 2, 16

    key = jax.random.PRNGKey(0)
    kx, kp = jax.random.split(key)
    # NHWC end-to-end: no layout transposes around the kernel.
    x = jax.random.normal(kx, (batch, spatial, spatial, inp), jnp.float32)

    kernel_params, ref_params = init_params(kp, inp, oup)

    out = jax.block_until_ready(original_mobile_forward(x, kernel_params))
    ref = jax.block_until_ready(reference_forward(x, ref_params))

    assert out.shape == (batch, spatial, spatial, oup)
    max_err = float(jnp.max(jnp.abs(out - ref)))
    # Pointwise conv uses bf16 MXU operands with f32 accumulation -> small delta.
    assert jnp.allclose(out, ref, rtol=3e-2, atol=3e-2), max_err

    print("KERNEL_OK")
</pallas_src>

<mosaic_0001>
module attributes {stable_mosaic.version = 11 : i64} {
  func.func @dwsep_kernel(%arg0: i32, %arg1: memref<1x256x64xf32, #tpu.memory_space<vmem>>, %arg2: memref<9x64xf32, #tpu.memory_space<vmem>>, %arg3: memref<1x64xf32, #tpu.memory_space<vmem>>, %arg4: memref<64x128xbf16, #tpu.memory_space<vmem>>, %arg5: memref<1x128xf32, #tpu.memory_space<vmem>>, %arg6: memref<1x256x128xf32, #tpu.memory_space<vmem>>) attributes {dimension_semantics = [#tpu.dimension_semantics<parallel>], iteration_bounds = array<i64: 2>, scalar_prefetch = 0 : i64, scratch_operands = 0 : i64, tpu.core_type = #tpu.core_type<tc>, window_params = [{transform_indices = @transform_0, window_bounds = array<i64: 1, 256, 64>}, {pipeline_mode = #tpu.pipeline_mode<synchronous>, transform_indices = @transform_1, window_bounds = array<i64: 9, 64>}, {pipeline_mode = #tpu.pipeline_mode<synchronous>, transform_indices = @transform_2, window_bounds = array<i64: 1, 64>}, {pipeline_mode = #tpu.pipeline_mode<synchronous>, transform_indices = @transform_3, window_bounds = array<i64: 64, 128>}, {pipeline_mode = #tpu.pipeline_mode<synchronous>, transform_indices = @transform_4, window_bounds = array<i64: 1, 128>}, {transform_indices = @transform_5, window_bounds = array<i64: 1, 256, 128>}]} {
    %c0 = arith.constant 0 : index
    %c0_0 = arith.constant 0 : index
    %c0_1 = arith.constant 0 : index
    %0 = vector.load %arg1[%c0, %c0_0, %c0_1] : memref<1x256x64xf32, #tpu.memory_space<vmem>>, vector<1x256x64xf32>
    %1 = vector.shape_cast %0 : vector<1x256x64xf32> to vector<256x64xf32>
    %2 = tpu.iota {dimensions = array<i32: 0>} : vector<16x16x64xi32>
    %3 = vector.shape_cast %2 : vector<16x16x64xi32> to vector<256x64xi32>
    %4 = tpu.iota {dimensions = array<i32: 1>} : vector<16x16x64xi32>
    %5 = vector.shape_cast %4 : vector<16x16x64xi32> to vector<256x64xi32>
    %c0_i32 = arith.constant 0 : i32
    %6 = vector.broadcast %c0_i32 : i32 to vector<256x64xi32>
    %7 = arith.cmpi sgt, %3, %6 : vector<256x64xi32>
    %c15_i32 = arith.constant 15 : i32
    %8 = vector.broadcast %c15_i32 : i32 to vector<256x64xi32>
    %9 = arith.cmpi slt, %3, %8 : vector<256x64xi32>
    %c0_i32_2 = arith.constant 0 : i32
    %10 = vector.broadcast %c0_i32_2 : i32 to vector<256x64xi32>
    %11 = arith.cmpi sgt, %5, %10 : vector<256x64xi32>
    %c15_i32_3 = arith.constant 15 : i32
    %12 = vector.broadcast %c15_i32_3 : i32 to vector<256x64xi32>
    %13 = arith.cmpi slt, %5, %12 : vector<256x64xi32>
    %cst = arith.constant 0.000000e+00 : f32
    %14 = vector.broadcast %cst : f32 to vector<256x64xf32>
    %c17_i32 = arith.constant 17 : i32
    %15 = tpu.dynamic_rotate %1 by %c17_i32 dim 0 : vector<256x64xf32>, i32 -> vector<256x64xf32>
    %16 = arith.andi %7, %11 : vector<256x64xi1>
    %cst_4 = arith.constant 0.000000e+00 : f32
    %17 = vector.broadcast %cst_4 : f32 to vector<256x64xf32>
    %18 = arith.select %16, %15, %17 : vector<256x64xi1>, vector<256x64xf32>
    %c0_5 = arith.constant 0 : index
    %c0_6 = arith.constant 0 : index
    %19 = vector.load %arg2[%c0_5, %c0_6] : memref<9x64xf32, #tpu.memory_space<vmem>>, vector<1x64xf32>
    %20 = vector.broadcast %19 : vector<1x64xf32> to vector<256x64xf32>
    %21 = arith.mulf %18, %20 : vector<256x64xf32>
    %22 = arith.addf %14, %21 : vector<256x64xf32>
    %c16_i32 = arith.constant 16 : i32
    %23 = tpu.dynamic_rotate %1 by %c16_i32 dim 0 : vector<256x64xf32>, i32 -> vector<256x64xf32>
    %cst_7 = arith.constant 0.000000e+00 : f32
    %24 = vector.broadcast %cst_7 : f32 to vector<256x64xf32>
    %25 = arith.select %7, %23, %24 : vector<256x64xi1>, vector<256x64xf32>
    %c1 = arith.constant 1 : index
    %c0_8 = arith.constant 0 : index
    %26 = vector.load %arg2[%c1, %c0_8] : memref<9x64xf32, #tpu.memory_space<vmem>>, vector<1x64xf32>
    %27 = vector.broadcast %26 : vector<1x64xf32> to vector<256x64xf32>
    %28 = arith.mulf %25, %27 : vector<256x64xf32>
    %29 = arith.addf %22, %28 : vector<256x64xf32>
    %c15_i32_9 = arith.constant 15 : i32
    %30 = tpu.dynamic_rotate %1 by %c15_i32_9 dim 0 : vector<256x64xf32>, i32 -> vector<256x64xf32>
    %31 = arith.andi %7, %13 : vector<256x64xi1>
    %cst_10 = arith.constant 0.000000e+00 : f32
    %32 = vector.broadcast %cst_10 : f32 to vector<256x64xf32>
    %33 = arith.select %31, %30, %32 : vector<256x64xi1>, vector<256x64xf32>
    %c2 = arith.constant 2 : index
    %c0_11 = arith.constant 0 : index
    %34 = vector.load %arg2[%c2, %c0_11] : memref<9x64xf32, #tpu.memory_space<vmem>>, vector<1x64xf32>
    %35 = vector.broadcast %34 : vector<1x64xf32> to vector<256x64xf32>
    %36 = arith.mulf %33, %35 : vector<256x64xf32>
    %37 = arith.addf %29, %36 : vector<256x64xf32>
    %c1_i32 = arith.constant 1 : i32
    %38 = tpu.dynamic_rotate %1 by %c1_i32 dim 0 : vector<256x64xf32>, i32 -> vector<256x64xf32>
    %cst_12 = arith.constant 0.000000e+00 : f32
    %39 = vector.broadcast %cst_12 : f32 to vector<256x64xf32>
    %40 = arith.select %11, %38, %39 : vector<256x64xi1>, vector<256x64xf32>
    %c3 = arith.constant 3 : index
    %c0_13 = arith.constant 0 : index
    %41 = vector.load %arg2[%c3, %c0_13] : memref<9x64xf32, #tpu.memory_space<vmem>>, vector<1x64xf32>
    %42 = vector.broadcast %41 : vector<1x64xf32> to vector<256x64xf32>
    %43 = arith.mulf %40, %42 : vector<256x64xf32>
    %44 = arith.addf %37, %43 : vector<256x64xf32>
    %c4 = arith.constant 4 : index
    %c0_14 = arith.constant 0 : index
    %45 = vector.load %arg2[%c4, %c0_14] : memref<9x64xf32, #tpu.memory_space<vmem>>, vector<1x64xf32>
    %46 = vector.broadcast %45 : vector<1x64xf32> to vector<256x64xf32>
    %47 = arith.mulf %1, %46 : vector<256x64xf32>
    %48 = arith.addf %44, %47 : vector<256x64xf32>
    %c255_i32 = arith.constant 255 : i32
    %49 = tpu.dynamic_rotate %1 by %c255_i32 dim 0 : vector<256x64xf32>, i32 -> vector<256x64xf32>
    %cst_15 = arith.constant 0.000000e+00 : f32
    %50 = vector.broadcast %cst_15 : f32 to vector<256x64xf32>
    %51 = arith.select %13, %49, %50 : vector<256x64xi1>, vector<256x64xf32>
    %c5 = arith.constant 5 : index
    %c0_16 = arith.constant 0 : index
    %52 = vector.load %arg2[%c5, %c0_16] : memref<9x64xf32, #tpu.memory_space<vmem>>, vector<1x64xf32>
    %53 = vector.broadcast %52 : vector<1x64xf32> to vector<256x64xf32>
    %54 = arith.mulf %51, %53 : vector<256x64xf32>
    %55 = arith.addf %48, %54 : vector<256x64xf32>
    %c241_i32 = arith.constant 241 : i32
    %56 = tpu.dynamic_rotate %1 by %c241_i32 dim 0 : vector<256x64xf32>, i32 -> vector<256x64xf32>
    %57 = arith.andi %9, %11 : vector<256x64xi1>
    %cst_17 = arith.constant 0.000000e+00 : f32
    %58 = vector.broadcast %cst_17 : f32 to vector<256x64xf32>
    %59 = arith.select %57, %56, %58 : vector<256x64xi1>, vector<256x64xf32>
    %c6 = arith.constant 6 : index
    %c0_18 = arith.constant 0 : index
    %60 = vector.load %arg2[%c6, %c0_18] : memref<9x64xf32, #tpu.memory_space<vmem>>, vector<1x64xf32>
    %61 = vector.broadcast %60 : vector<1x64xf32> to vector<256x64xf32>
    %62 = arith.mulf %59, %61 : vector<256x64xf32>
    %63 = arith.addf %55, %62 : vector<256x64xf32>
    %c240_i32 = arith.constant 240 : i32
    %64 = tpu.dynamic_rotate %1 by %c240_i32 dim 0 : vector<256x64xf32>, i32 -> vector<256x64xf32>
    %cst_19 = arith.constant 0.000000e+00 : f32
    %65 = vector.broadcast %cst_19 : f32 to vector<256x64xf32>
    %66 = arith.select %9, %64, %65 : vector<256x64xi1>, vector<256x64xf32>
    %c7 = arith.constant 7 : index
    %c0_20 = arith.constant 0 : index
    %67 = vector.load %arg2[%c7, %c0_20] : memref<9x64xf32, #tpu.memory_space<vmem>>, vector<1x64xf32>
    %68 = vector.broadcast %67 : vector<1x64xf32> to vector<256x64xf32>
    %69 = arith.mulf %66, %68 : vector<256x64xf32>
    %70 = arith.addf %63, %69 : vector<256x64xf32>
    %c239_i32 = arith.constant 239 : i32
    %71 = tpu.dynamic_rotate %1 by %c239_i32 dim 0 : vector<256x64xf32>, i32 -> vector<256x64xf32>
    %72 = arith.andi %9, %13 : vector<256x64xi1>
    %cst_21 = arith.constant 0.000000e+00 : f32
    %73 = vector.broadcast %cst_21 : f32 to vector<256x64xf32>
    %74 = arith.select %72, %71, %73 : vector<256x64xi1>, vector<256x64xf32>
    %c8 = arith.constant 8 : index
    %c0_22 = arith.constant 0 : index
    %75 = vector.load %arg2[%c8, %c0_22] : memref<9x64xf32, #tpu.memory_space<vmem>>, vector<1x64xf32>
    %76 = vector.broadcast %75 : vector<1x64xf32> to vector<256x64xf32>
    %77 = arith.mulf %74, %76 : vector<256x64xf32>
    %78 = arith.addf %70, %77 : vector<256x64xf32>
    %c0_23 = arith.constant 0 : index
    %c0_24 = arith.constant 0 : index
    %79 = vector.load %arg3[%c0_23, %c0_24] : memref<1x64xf32, #tpu.memory_space<vmem>>, vector<1x64xf32>
    %80 = vector.broadcast %79 : vector<1x64xf32> to vector<256x64xf32>
    %81 = arith.addf %78, %80 : vector<256x64xf32>
    %cst_25 = arith.constant 0.000000e+00 : f32
    %82 = vector.broadcast %cst_25 : f32 to vector<256x64xf32>
    %83 = arith.maximumf %81, %82 : vector<256x64xf32>
    %84 = arith.truncf %83 : vector<256x64xf32> to vector<256x64xbf16>
    %c0_26 = arith.constant 0 : index
    %c0_27 = arith.constant 0 : index
    %85 = vector.load %arg4[%c0_26, %c0_27] : memref<64x128xbf16, #tpu.memory_space<vmem>>, vector<64x128xbf16>
    %cst_28 = arith.constant dense<0.000000e+00> : vector<256x128xf32>
    %86 = tpu.matmul %84, %85, %cst_28 {dimension_numbers = #tpu.dot_dimension_numbers<[1], [0], [0], [1], [0, 0, 1, 1], [], []>} : vector<256x64xbf16>, vector<64x128xbf16>, vector<256x128xf32> -> vector<256x128xf32>
    %c0_29 = arith.constant 0 : index
    %c0_30 = arith.constant 0 : index
    %87 = vector.load %arg5[%c0_29, %c0_30] : memref<1x128xf32, #tpu.memory_space<vmem>>, vector<1x128xf32>
    %88 = vector.broadcast %87 : vector<1x128xf32> to vector<256x128xf32>
    %89 = arith.addf %86, %88 : vector<256x128xf32>
    %cst_31 = arith.constant 0.000000e+00 : f32
    %90 = vector.broadcast %cst_31 : f32 to vector<256x128xf32>
    %91 = arith.maximumf %89, %90 : vector<256x128xf32>
    %c0_32 = arith.constant 0 : index
    %c0_33 = arith.constant 0 : index
    %c0_34 = arith.constant 0 : index
    %92 = vector.load %arg6[%c0_32, %c0_33, %c0_34] : memref<1x256x128xf32, #tpu.memory_space<vmem>>, vector<1x256x128xf32>
    %93 = vector.shape_cast %92 : vector<1x256x128xf32> to vector<256x128xf32>
    %94 = vector.shape_cast %91 : vector<256x128xf32> to vector<1x256x128xf32>
    tpu.vector_store %arg6[%c0_32, %c0_33, %c0_34], %94 {strides = array<i32>} : memref<1x256x128xf32, #tpu.memory_space<vmem>>, vector<1x256x128xf32>,
    return
  }
  func.func @transform_0(%arg0: i32) -> (i32, i32, i32) {
    %c0_i32 = arith.constant 0 : i32
    %c0_i32_0 = arith.constant 0 : i32
    %c0_i32_1 = arith.constant 0 : i32
    return %arg0, %c0_i32, %c0_i32_0 : i32, i32, i32
  }
  func.func @transform_1(%arg0: i32) -> (i32, i32) {
    %c0_i32 = arith.constant 0 : i32
    %c0_i32_0 = arith.constant 0 : i32
    %c0_i32_1 = arith.constant 0 : i32
    return %c0_i32, %c0_i32_0 : i32, i32
  }
  func.func @transform_2(%arg0: i32) -> (i32, i32) {
    %c0_i32 = arith.constant 0 : i32
    %c0_i32_0 = arith.constant 0 : i32
    %c0_i32_1 = arith.constant 0 : i32
    return %c0_i32, %c0_i32_0 : i32, i32
  }
  func.func @transform_3(%arg0: i32) -> (i32, i32) {
    %c0_i32 = arith.constant 0 : i32
    %c0_i32_0 = arith.constant 0 : i32
    %c0_i32_1 = arith.constant 0 : i32
    return %c0_i32, %c0_i32_0 : i32, i32
  }
  func.func @transform_4(%arg0: i32) -> (i32, i32) {
    %c0_i32 = arith.constant 0 : i32
    %c0_i32_0 = arith.constant 0 : i32
    %c0_i32_1 = arith.constant 0 : i32
    return %c0_i32, %c0_i32_0 : i32, i32
  }
  func.func @transform_5(%arg0: i32) -> (i32, i32, i32) {
    %c0_i32 = arith.constant 0 : i32
    %c0_i32_0 = arith.constant 0 : i32
    %c0_i32_1 = arith.constant 0 : i32
    return %arg0, %c0_i32, %c0_i32_0 : i32, i32, i32
  }
}

</mosaic_0001>

<bundles_post_ra>
// kernel: tpu_custom_call.1
= control target key start
LH: loop header
LB: loop body
LE: loop exit
PB: predicated region body
PF: predicated region fallthrough
CT: control target
= control target key end

     0   :  { %10 = vsyncpa [#allocation3], 0  ;;  %s3146_s0 = inlined_call_operand.vmem [shape: f32[2,256,64], index: 0, kind: input, shape index: {}]   ;;  %s3147_s1 = inlined_call_operand.vmem [shape: f32[9,64], index: 1, kind: input, shape index: {}]   ;;  %s3148_s2 = inlined_call_operand.vmem [shape: f32[1,64], index: 2, kind: input, shape index: {}]   ;;  %s3149_s3 = inlined_call_operand.vmem [shape: bf16[64,128], index: 3, kind: input, shape index: {}]   ;;  %s3150_s4 = inlined_call_operand.vmem [shape: f32[1,128], index: 4, kind: input, shape index: {}]   ;;  %s3151_s5 = inlined_call_operand.hbm [shape: f32[2,256,128], index: 5, kind: output, shape index: {}]  }
   0x1   :  { %12 = vsyncpa [#allocation3 + $0x1], 0  ;;  %s1674_s18 = smov 0   ;;  %s1676_s19 = smov 0  }
   0x2   :  { %s1678_s20 = smov 0   ;;  %s1680_s21 = smov 0  }
   0x3 LB: > { %s1695_s22 = sadd.s32 4294967295, %s1640_s21   ;;  %s1442_s23 = sadd.s32 4294967294, %s1640_s21   ;;  %s1640_s21 = sphi %s1680_s21, %s3406_s21   ;;  %s1636_s20 = sphi %s1678_s20, %s3405_s20   ;;  %s1632_s19 = sphi %s1676_s19, %s3404_s19   ;;  %s1628_s18 = sphi %s1674_s18, %s3403_s18  }
   0x4   : > { %s1699_s24 = sadd.s32 1, %s1640_s21   ;;  %s135_s25 = sadd.s32 1, %s1636_s20 }
   0x5   : > { %s132_s26 = ssub.s32 %s1640_s21, %s1699_s24  ;;  %p145_p0 = scmp.ne.s32.totalorder %s1636_s20, %s1632_s19 }
   0x6   : > { %p133_p1 = scmp.eq.s32.totalorder %s132_s26, 0  ;;  %p146_p2 = scmp.eq.s32.totalorder %s1695_s22, 1 }
   0x7   : > { %p151_p3 = scmp.ne.s32.totalorder %s1632_s19, %s1628_s18  ;;  %p152_p4 = scmp.eq.s32.totalorder %s1442_s23, 1 }
   0x8   : > { %s1710_s27 = scalar_select %p133_p1, %s1636_s20, %s135_s25  }
   0x9   : > { %p1712_p5 = por %p146_p2, %p145_p0  ;;  %p1716_p6 = por %p152_p4, %p151_p3 }
   0xa   : > { %p1445_p7 = scmp.ge.s32.totalorder %s1640_s21, 1  ;;  %p190_p8 = scmp.lt.s32.totalorder %s1640_s21, 3 }
   0xc   : > { %p191_p9 = pnand %p1445_p7, %p190_p8 }
   0xe   : > { %194 = sbr.rel (%p191_p9) target bundleno = 382 (0x17e), region = 40 }
  0x13   : > { %v1490_v0 = vld [vmem:[%s3149_s3 + $0x18] sm:$0xff]  ;;  %p218_p10 = scmp.lt.s32.totalorder %s1695_s22, 1  ;;  %v256_v1 = vlaneseq  ;;  %v1489_v2 = vld [vmem:[%s3149_s3 + $0x10] sm:$0xff]  ;;  %v1732_v3 = vld [vmem:[%s3147_s1] ss:$0 sm:$0xff]  ;;  %vm1162_vm4 = vcmask 523264  }
  0x14   : > { %1215 = vmatpush.bf16.msra.mxu0 %v1490_v0  ;;  %1492 = vmatpush.bf16.msra.mxu1 %v1490_v0  ;;  %v1740_v5 = vld [vmem:[%s3147_s1 + $0x1] ss:$0 sm:$0xff]  ;;  %v357_v6 = vmul.f32 0.0, %v1732_v3  ;;  %v1746_v7 = vld [vmem:[%s3147_s1 + $0x2] ss:$0 sm:$0xff]  ;;  %v1488_v10 = vld [vmem:[%s3149_s3 + $0x8] sm:$0xff] }
  0x15   : > { %s219_s11 = scalar_select %p218_p10, %s1695_s22, 1  ;;  %v1735_v4 = vshrl.u32 %v256_v1, 7  ;;  %1493 = vmatpush.bf16.msra.mxu2 %v1490_v0  ;;  %1494 = vmatpush.bf16.msra.mxu3 %v1490_v0  ;;  %v421_v9 = vmul.f32 0.0, %v1740_v5  ;;  %v577_v15 = vmul.f32 0.0, %v1746_v7  ;;  %v1487_v31 = vld [vmem:[%s3149_s3] sm:$0xff] }
  0x16   : > { %v1823_v40 = vld [vmem:[%s3147_s1 + $0x3] ss:$0 sm:$0xff]  ;;  %v1842_v49 = vld [vmem:[%s3147_s1 + $0x4] ss:$0 sm:$0xff]  ;;  %v1860_v54 = vld [vmem:[%s3147_s1 + $0x5] ss:$0 sm:$0xff] }
  0x17   : > { %s1486_s16 = sshll.u32 %s219_s11, 8  ;;  %v1749_v8 = vadd.s32 8, %v1735_v4  ;;  %vm259_vm0 = vcmp.gt.s32.totalorder %v1735_v4, 0  ;;  %vm294_vm1 = vcmp.lt.s32.totalorder %v1735_v4, 1  ;;  %v452_v14 = vadd.f32 %v421_v9, %v357_v6  ;;  %v1869_v59 = vld [vmem:[%s3147_s1 + $0x6] ss:$0 sm:$0xff] }
  0x18   : > { %s1758_s30 = scalar_lea.vmem %s3146_s0, %s1486_s16  ;;  %1216 = vmatpush.bf16.msra.mxu0 %v1489_v2  ;;  %1495 = vmatpush.bf16.msra.mxu1 %v1489_v2  ;;  %vm514_vm3 = vcmp.lt.s32.totalorder %v1735_v4, 7  ;;  %v1879_v63 = vld [vmem:[%s3147_s1 + $0x7] ss:$0 sm:$0xff]  ;;  %s215_s12 = sand.u32 1, %s1632_s19  }
  0x19   : > { %v1763_v11 = vld [vmem:[%s1758_s30] sm:$0xff]  ;;  %v1766_v12 = vld [vmem:[%s1758_s30 + $0x8] sm:$0xff]  ;;  %v1769_v13 = vld [vmem:[%s1758_s30 + $0x10] sm:$0xff]  ;;  %vm262_vm2 = vcmp.lt.s32.totalorder %v1749_v8, 15  ;;  %1496 = vmatpush.bf16.msra.mxu2 %v1489_v2  ;;  %1497 = vmatpush.bf16.msra.mxu3 %v1489_v2  ;;  %v608_v57 = vadd.f32 %v577_v15, %v452_v14  ;;  %s1491_s16 = sshll.u32 %s1695_s22, 8  ;;  %s1365_s22 = scalar_lea.sflag [#allocation3], %s215_s12 }
  0x1a   : > { %3232 = vst [vmem:[#allocation5_spill] sm:$0xff] %v1763_v11  ;;  %v1775_v16 = vld [vmem:[%s1758_s30 + $0x18] sm:$0xff]  ;;  %v263_v18 = vrot.slane %v1763_v11, 7  ;;  %v264_v19 = vrot.slane %v1766_v12, 7  ;;  %v265_v20 = vrot.slane %v1769_v13, 7  ;;  %v424_v21 = vmul.f32 %v1740_v5, %v1769_v13  ;;  %v1791_v26 = vld [vmem:[%s1758_s30 + $0x20] sm:$0xff]  ;;  %s1376_s25 = scalar_lea.hbm %s3151_s5, %s1491_s16 }
  0x1b   : > { %v1778_v17 = vld [vmem:[%s1758_s30 + $0xf8] sm:$0xff]  ;;  %v3156_v22 = vrot.slane %v1775_v16, 7  ;;  %v425_v24 = vmul.f32 %v1740_v5, %v1775_v16  ;;  %v3152_v25 = vrot.slane %v1763_v11, 1  ;;  %v484_v29 = vrot.slane %v1766_v12, 1  ;;  %v1845_v50 = vld [vmem:[%s1758_s30 + $0x28] sm:$0xff]  ;;  %s1379_s6 = sshll.u32 %s1376_s25, 4  ;;  %s1380_s6 = int_to_ptr.hbm [resolvable:$true] %s1379_s6 }
  0x1c   : > { %3233 = vst [vmem:[#allocation6_spill] sm:$0xff] %v1778_v17  ;;  %v3153_v23 = vrot.slane %v1778_v17, 7  ;;  %v322_v27 = vsel %vm294_vm1, %v264_v19, %v265_v20  ;;  %v323_v28 = vsel %vm294_vm1, %v263_v18, %v264_v19  ;;  %v485_v30 = vrot.slane %v1769_v13, 1  ;;  %1217 = vmatpush.bf16.msra.mxu0 %v1488_v10  ;;  %1498 = vmatpush.bf16.msra.mxu1 %v1488_v10  ;;  %s1592_s7 = sshra.s32 %s1380_s6, 4  ;;  %s1598_s11 = scalar_lea.hbm %s3151_s5, 512  ;;  %s1593_s7 = int_to_ptr.hbm [resolvable:$true] %s1592_s7 }
  0x1d   : > { %v321_v32 = vsel %vm294_vm1, %v265_v20, %v3156_v22  ;;  %v327_v34 = vsel %vm259_vm0, %v322_v27, 0.0  ;;  %v1813_v35 = vmul.f32 %v1732_v3, %v323_v28  ;;  %1499 = vmatpush.bf16.msra.mxu2 %v1488_v10  ;;  %1500 = vmatpush.bf16.msra.mxu3 %v1488_v10  ;;  %v486_v39 = vrot.slane %v1775_v16, 1  ;;  %v1891_v10 = vld [vmem:[%s3147_s1 + $0x8] ss:$0 sm:$0xff]  ;;  %v1898_v20 = vld [vmem:[%s1758_s30 + $0x30] sm:$0xff]  ;;  %s1594_s8 = scalar_lea.hbm %s1593_s7, 256  ;;  %p1599_p0 = scmp.lt.s32.totalorder %s1593_s7, %s3151_s5 }
  0x1e   : > { %v324_v33 = vsel %vm294_vm1, %v3153_v23, %v263_v18  ;;  %v360_v37 = vmul.f32 %v1732_v3, %v327_v34  ;;  %v361_v38 = vmul.f32 %v1732_v3, %v321_v32  ;;  %v3155_v42 = vrot.slane %v1791_v26, 1  ;;  %p1595_p11 = scmp.ne.s32.totalorder %s1593_s7, %s1594_s8  ;;  %p1600_p1 = scmp.lt.s32.totalorder %s1598_s11, %s1594_s8 }
  0x1f   : > { %v325_v36 = vsel %vm259_vm0, %v324_v33, 0.0  ;;  %v543_v43 = vsel %vm514_vm3, %v484_v29, %v485_v30  ;;  %v544_v44 = vsel %vm514_vm3, %v3152_v25, %v484_v29  ;;  %v542_v47 = vsel %vm514_vm3, %v485_v30, %v486_v39  ;;  %v1908_v29 = vld [vmem:[%s1758_s30 + $0x38] sm:$0xff]  ;;  %v1911_v30 = vld [vmem:[%s1758_s30 + $0x48] sm:$0xff] }
  0x20   : > { %v1826_v41 = vmul.f32 %v1732_v3, %v325_v36  ;;  %v455_v45 = vadd.f32 %v424_v21, %v360_v37  ;;  %v456_v46 = vadd.f32 %v425_v24, %v361_v38  ;;  %v546_v48 = vsel %vm262_vm2, %v543_v43, 0.0  ;;  %1218 = vmatpush.bf16.msra.mxu0 %v1487_v31  ;;  %1501 = vmatpush.bf16.msra.mxu1 %v1487_v31  ;;  %v1920_v38 = vld [vmem:[%s1758_s30 + $0x58] sm:$0xff]  ;;  %p1596_p12 = pnand %p1595_p11, %p1712_p5  ;;  %p1601_p2 = por %p1600_p1, %p1599_p0 }
  0x21   : > { %v541_v51 = vsel %vm514_vm3, %v486_v39, %v3155_v42  ;;  %v1852_v52 = vmul.f32 %v1746_v7, %v544_v44  ;;  %v1855_v53 = vmul.f32 %v1746_v7, %v546_v48  ;;  %1502 = vmatpush.bf16.msra.mxu2 %v1487_v31  ;;  %1503 = vmatpush.bf16.msra.mxu3 %v1487_v31  ;;  %v3157_v0 = vrot.slane %v1845_v50, 7 }
  0x22   : > { %v548_v55 = vsel %vm262_vm2, %v541_v51, 0.0  ;;  %v580_v56 = vmul.f32 %v1746_v7, %v542_v47  ;;  %v646_v58 = vmul.f32 %v1823_v40, %v325_v36  ;;  %v647_v61 = vmul.f32 %v1823_v40, %v323_v28  ;;  %3236 = vst [vmem:[#allocation9_spill] sm:$0xff] %v1911_v30  ;;  %p1597_p13 = pneg %p1596_p12 }
  0x23   : > { %v581_v60 = vmul.f32 %v1746_v7, %v548_v55  ;;  %v1874_v62 = vmul.f32 %v1823_v40, %v327_v34  ;;  %v712_v6 = vmul.f32 %v1842_v49, %v1763_v11  ;;  %v713_v9 = vmul.f32 %v1842_v49, %v1766_v12  ;;  %3237 = vst [vmem:[#allocation10_spill] sm:$0xff] %v1920_v38 }
  0x24   : > { %v1882_v1 = vadd.f32 %v580_v56, %v455_v45  ;;  %v678_v2 = vadd.f32 %v646_v58, %v608_v57  ;;  %v679_v15 = vadd.f32 %v647_v61, %v608_v57  ;;  %v783_v18 = vmul.f32 %v1860_v54, %v544_v44  ;;  %v1926_v44 = vld [vmem:[%s1758_s30 + $0x40] sm:$0xff]  ;;  %p1602_p3 = pnand %p1601_p2, %p1597_p13 }
  0x25   : > { %v1893_v14 = vadd.f32 %v581_v60, %v456_v46  ;;  %v784_v19 = vmul.f32 %v1860_v54, %v546_v48  ;;  %v1901_v21 = vmul.f32 %v1823_v40, %v321_v32  ;;  %v1904_v27 = vmul.f32 %v1860_v54, %v542_v47  ;;  %3238 = vst [vmem:[#allocation11_spill] sm:$0xff] %v1926_v44  ;;  %v1930_v48 = vld [vmem:[%s1758_s30 + $0x50] sm:$0xff] }
  0x26   : > { %3234 = vst [vmem:[#allocation7_spill] sm:$0xff] %v1882_v1  ;;  %v744_v24 = vadd.f32 %v712_v6, %v678_v2  ;;  %v849_v28 = vmul.f32 %v1869_v59, %v327_v34  ;;  %v745_v31 = vadd.f32 %v713_v9, %v679_v15  ;;  %v1914_v33 = vmul.f32 %v1860_v54, %v548_v55 }
  0x27   : > { %3235 = vst [vmem:[#allocation8_spill] sm:$0xff] %v1893_v14  ;;  %v850_v36 = vmul.f32 %v1869_v59, %v321_v32  ;;  %v914_v37 = vmul.f32 %v1879_v63, %v1769_v13  ;;  %v915_v43 = vmul.f32 %v1879_v63, %v1775_v16  ;;  %v979_v34 = vmul.f32 %v1891_v10, %v542_v47 }
  0x28   : > { %v815_v39 = vadd.f32 %v783_v18, %v744_v24  ;;  %v269_v45 = vrot.slane %v1898_v20, 7  ;;  %v816_v46 = vadd.f32 %v784_v19, %v745_v31  ;;  %3239 = vst [vmem:[#allocation12_spill] sm:$0xff] %v1930_v48  ;;  %v270_v32 = vrot.slane %v1908_v29, 7  ;;  %v1953_v18 = vld [vmem:[%s3148_s2] ss:$0 sm:$0xff] }
  0x29   : > { %v271_v51 = vrot.slane %v1926_v44, 7  ;;  %v272_v56 = vrot.slane %v1911_v30, 7  ;;  %v273_v58 = vrot.slane %v1930_v48, 7  ;;  %v3154_v60 = vrot.slane %v1920_v38, 7 }
  0x2a   : > { %v880_v57 = vadd.f32 %v849_v28, %v815_v39  ;;  %v318_v47 = vsel %vm294_vm1, %v3157_v0, %v269_v45  ;;  %v881_v61 = vadd.f32 %v850_v36, %v816_v46  ;;  %v980_v2 = vmul.f32 %v1891_v10, %v548_v55 }
  0x2b   : > { %v1944_v6 = vsel %vm294_vm1, %v271_v51, %v272_v56  ;;  %v1948_v9 = vsel %vm294_vm1, %v269_v45, %v270_v32  ;;  %v314_v19 = vsel %vm294_vm1, %v272_v56, %v273_v58  ;;  %v316_v55 = vsel %vm294_vm1, %v270_v32, %v271_v51 }
  0x2c   : > { %3240 = vst [vmem:[#allocation13_spill] sm:$0xff] %v1944_v6  ;;  %v945_v15 = vadd.f32 %v914_v37, %v880_v57  ;;  %v1961_v24 = vsel %vm259_vm0, %v318_v47, 0.0  ;;  %v946_v28 = vadd.f32 %v915_v43, %v881_v61  ;;  %v1967_v31 = vsel %vm294_vm1, %v273_v58, %v3154_v60  ;;  %v1989_v58 = vld [vmem:[%s1758_s30 + $0x60] sm:$0xff] }
  0x2d   : > { %3241 = vst [vmem:[#allocation14_spill] sm:$0xff] %v1948_v9  ;;  %v1971_v36 = vsel %vm259_vm0, %v314_v19, 0.0  ;;  %v364_v37 = vmul.f32 %v1732_v3, %v1961_v24  ;;  %v365_v45 = vmul.f32 %v1732_v3, %v1948_v9  ;;  %v369_v46 = vmul.f32 %v1732_v3, %v1967_v31 }
  0x2e   : > { %3242 = vst [vmem:[#allocation15_spill] sm:$0xff] %v1961_v24  ;;  %v1010_v39 = vadd.f32 %v979_v34, %v945_v15  ;;  %v368_v43 = vmul.f32 %v1732_v3, %v1971_v36  ;;  %v1011_v32 = vadd.f32 %v980_v2, %v946_v28  ;;  %v428_v51 = vmul.f32 %v1740_v5, %v1898_v20  ;;  %v2105_v24 = vld [vmem:[%s1758_s30 + $0x80] sm:$0xff] }
  0x2f   : > { %v429_v56 = vmul.f32 %v1740_v5, %v1908_v29  ;;  %v432_v57 = vmul.f32 %v1740_v5, %v1930_v48  ;;  %v433_v47 = vmul.f32 %v1740_v5, %v1920_v38  ;;  %v490_v2 = vrot.slane %v1908_v29, 1  ;;  %3261 = vst [vmem:[#allocation33_spill] sm:$0xff] %v2105_v24 }
  0x30   : > { %v1046_v34 = vadd.f32 %v1953_v18, %v1010_v39  ;;  %v1047_v15 = vadd.f32 %v1953_v18, %v1011_v32  ;;  %v1998_v19 = vsel %vm259_vm0, %v316_v55, 0.0  ;;  %v459_v28 = vadd.f32 %v428_v51, %v364_v37 }
  0x31   : > { %3243 = vst [vmem:[#allocation16_spill] sm:$0xff] %v1998_v19  ;;  %v460_v25 = vadd.f32 %v429_v56, %v365_v45  ;;  %v463_v60 = vadd.f32 %v432_v57, %v368_v43  ;;  %v491_v39 = vrot.slane %v1926_v44, 1  ;;  %v492_v42 = vrot.slane %v1911_v30, 1 }
  0x32   : > { %v1078_v23 = vmax.f32 %v1046_v34, 0.0  ;;  %v1079_v22 = vmax.f32 %v1047_v15, 0.0  ;;  %v493_v0 = vrot.slane %v1930_v48, 1  ;;  %v494_v61 = vrot.slane %v1920_v38, 1 }
  0x33   : > { %v3158_v29 = vrot.slane %v1989_v58, 1  ;;  %v464_v32 = vadd.f32 %v433_v47, %v369_v46  ;;  %v2007_v55 = vsel %vm514_vm3, %v491_v39, %v492_v42  ;;  %v537_v37 = vsel %vm514_vm3, %v490_v2, %v491_v39 }
  0x34   : > { %3244 = vst [vmem:[#allocation17_spill] sm:$0xff] %v2007_v55  ;;  %v3245_v45 = vrot.slane %v1898_v20, 1  ;;  %v1110_v51 = vpack.c.bf16 %v1079_v22, %v1078_v23  ;;  %v535_v46 = vsel %vm514_vm3, %v492_v42, %v493_v0  ;;  %v654_v57 = vmul.f32 %v1823_v40, %v1998_v19 }
  0x35   : > { %v533_v56 = vsel %vm514_vm3, %v494_v61, %v3158_v29  ;;  %v534_v34 = vsel %vm514_vm3, %v493_v0, %v494_v61  ;;  %v2029_v47 = vsel %vm262_vm2, %v537_v37, 0.0  ;;  %v2033_v22 = vsel %vm262_vm2, %v535_v46, 0.0 }
  0x36   : > { %v2015_v43 = vsel %vm514_vm3, %v3245_v45, %v490_v2  ;;  %3247 = vst [vmem:[#allocation19_spill] sm:$0xff] %v2029_v47  ;;  %1465 = vmatmul.msk.bf16.vlgmr.msra.gmra.mxu0 %vm1162_vm4, %v1110_v51  ;;  %v556_v42 = vsel %vm262_vm2, %v533_v56, 0.0  ;;  %v585_v2 = vmul.f32 %v1746_v7, %v2029_v47  ;;  %v2044_v0 = vmul.f32 %v1746_v7, %v2007_v55 }
  0x37   : > { %3246 = vst [vmem:[#allocation18_spill] sm:$0xff] %v2015_v43  ;;  %v584_v23 = vmul.f32 %v1746_v7, %v2015_v43  ;;  %v588_v61 = vmul.f32 %v1746_v7, %v534_v34  ;;  %v2049_v15 = vmul.f32 %v1746_v7, %v2033_v22  ;;  %v589_v39 = vmul.f32 %v1746_v7, %v556_v42 }
  0x38   : > { %3248 = vst [vmem:[#allocation20_spill] sm:$0xff] %v2033_v22  ;;  %v655_v45 = vmul.f32 %v1823_v40, %v1944_v6  ;;  %v616_v51 = vadd.f32 %v585_v2, %v460_v25  ;;  %v2058_v46 = vmul.f32 %v1823_v40, %v1971_v36  ;;  %v720_v29 = vmul.f32 %v1842_v49, %v1926_v44 }
  0x39   : > { %3249 = vst [vmem:[#allocation21_spill] sm:$0xff] %v2044_v0  ;;  %v615_v37 = vadd.f32 %v584_v23, %v459_v28  ;;  %v2054_v56 = vadd.f32 %v588_v61, %v463_v60  ;;  %v2062_v17 = vadd.f32 %v589_v39, %v464_v32  ;;  %v721_v28 = vmul.f32 %v1842_v49, %v1911_v30  ;;  %v2081_v61 = vld [vmem:[%s1758_s30 + $0x70] sm:$0xff]  ;;  %v2084_v39 = vld [vmem:[%s1758_s30 + $0x78] sm:$0xff] }
  0x3a   : > { %3250 = vst [vmem:[#allocation22_spill] sm:$0xff] %v2049_v15  ;;  %v791_v23 = vmul.f32 %v1860_v54, %v2007_v55  ;;  %v2070_v25 = vmul.f32 %v1823_v40, %v1967_v31  ;;  %v687_v60 = vadd.f32 %v655_v45, %v616_v51  ;;  %v792_v2 = vmul.f32 %v1860_v54, %v2033_v22  ;;  %v2094_v22 = vld [vmem:[%s1758_s30 + $0x88] sm:$0xff] }
  0x3b   : > { %3251 = vst [vmem:[#allocation23_spill] sm:$0xff] %v2054_v56  ;;  %v686_v47 = vadd.f32 %v654_v57, %v615_v37  ;;  %v2075_v32 = vmul.f32 %v1860_v54, %v534_v34  ;;  %v2078_v57 = vld [vmem:[%s1758_s30 + $0x68] sm:$0xff]  ;;  %v2087_v55 = vmul.f32 %v1860_v54, %v556_v42  ;;  %v857_v45 = vmul.f32 %v1869_v59, %v1971_v36  ;;  %v2108_v36 = vld [vmem:[%s1758_s30 + $0x90] sm:$0xff] }
  0x3c   : > { %3252 = vst [vmem:[#allocation24_spill] sm:$0xff] %v2058_v46  ;;  %v858_v51 = vmul.f32 %v1869_v59, %v1967_v31  ;;  %v922_v56 = vmul.f32 %v1879_v63, %v1930_v48  ;;  %v923_v43 = vmul.f32 %v1879_v63, %v1920_v38  ;;  %v3172_v31 = vrot.slane %v2078_v57, 7 }
  0x3d   : > { %3253 = vst [vmem:[#allocation25_spill] sm:$0xff] %v2062_v17  ;;  %v752_v37 = vadd.f32 %v720_v29, %v686_v47  ;;  %v753_v17 = vadd.f32 %v721_v28, %v687_v60  ;;  %v987_v29 = vmul.f32 %v1891_v10, %v534_v34  ;;  %v2102_v47 = vld [vmem:[%s1758_s30 + $0x98] sm:$0xff]  ;;  %v277_v14 = vrot.slane %v2081_v61, 7 }
  0x3e   : > { %3254 = vst [vmem:[#allocation26_spill] sm:$0xff] %v2070_v25  ;;  %v278_v28 = vrot.slane %v2084_v39, 7  ;;  %v279_v1 = vrot.slane %v2105_v24, 7  ;;  %v281_v34 = vrot.slane %v2108_v36, 7  ;;  %v499_v0 = vrot.slane %v2105_v24, 1 }
  0x3f   : > { %3255 = vst [vmem:[#allocation27_spill] sm:$0xff] %v2075_v32  ;;  %v823_v9 = vadd.f32 %v791_v23, %v752_v37  ;;  %v824_v60 = vadd.f32 %v792_v2, %v753_v17  ;;  %v3171_v23 = vrot.slane %v2102_v47, 7  ;;  %v310_v48 = vsel %vm294_vm1, %v3172_v31, %v277_v14 }
  0x40   : > { %3256 = vst [vmem:[#allocation28_spill] sm:$0xff] %v2078_v57  ;;  %v2119_v37 = vsel %vm294_vm1, %v277_v14, %v278_v28  ;;  %v988_v17 = vmul.f32 %v1891_v10, %v556_v42  ;;  %v2142_v42 = vsel %vm259_vm0, %v310_v48, 0.0  ;;  %v436_v48 = vmul.f32 %v1740_v5, %v2081_v61 }
  0x41   : > { %3257 = vst [vmem:[#allocation29_spill] sm:$0xff] %v2084_v39  ;;  %v888_v32 = vadd.f32 %v857_v45, %v823_v9  ;;  %v889_v25 = vadd.f32 %v858_v51, %v824_v60  ;;  %v308_v9 = vsel %vm294_vm1, %v278_v28, %v279_v1  ;;  %v2134_v46 = vsel %vm294_vm1, %v281_v34, %v3171_v23 }
  0x42   : > { %3258 = vst [vmem:[#allocation30_spill] sm:$0xff] %v2087_v55  ;;  %v280_v55 = vrot.slane %v2094_v22, 7  ;;  %v3184_v23 = vrot.slane %v2081_v61, 1  ;;  %v500_v38 = vrot.slane %v2094_v22, 1  ;;  %v502_v30 = vrot.slane %v2102_v47, 1 }
  0x43   : > { %3259 = vst [vmem:[#allocation31_spill] sm:$0xff] %v2094_v22  ;;  %v953_v45 = vadd.f32 %v922_v56, %v888_v32  ;;  %v954_v51 = vadd.f32 %v923_v43, %v889_v25  ;;  %v372_v56 = vmul.f32 %v1732_v3, %v2142_v42  ;;  %v373_v32 = vmul.f32 %v1732_v3, %v2119_v37 }
  0x44   : > { %3260 = vst [vmem:[#allocation32_spill] sm:$0xff] %v2102_v47  ;;  %v306_v2 = vsel %vm294_vm1, %v280_v55, %v281_v34  ;;  %v2138_v14 = vsel %vm294_vm1, %v279_v1, %v280_v55  ;;  %v2152_v34 = vsel %vm259_vm0, %v308_v9, 0.0  ;;  %v377_v43 = vmul.f32 %v1732_v3, %v2134_v46 }
  0x45   : > { %3262 = vst [vmem:[#allocation34_spill] sm:$0xff] %v2108_v36  ;;  %v343_v28 = vsel %vm259_vm0, %v306_v2, 0.0  ;;  %v1018_v60 = vadd.f32 %v987_v29, %v953_v45  ;;  %v1019_v55 = vadd.f32 %v988_v17, %v954_v51  ;;  %v437_v25 = vmul.f32 %v1740_v5, %v2084_v39  ;;  %v2165_v45 = vld [vmem:[%s1758_s30 + $0xa0] sm:$0xff] }
  0x46   : > { %3263 = vst [vmem:[#allocation35_spill] sm:$0xff] %v2119_v37  ;;  %v376_v1 = vmul.f32 %v1732_v3, %v343_v28  ;;  %v440_v2 = vmul.f32 %v1740_v5, %v2108_v36  ;;  %v441_v9 = vmul.f32 %v1740_v5, %v2102_v47  ;;  %v498_v17 = vrot.slane %v2084_v39, 1 }
  0x47   : > { %3264 = vst [vmem:[#allocation36_spill] sm:$0xff] %v2138_v14  ;;  %v1054_v29 = vadd.f32 %v1953_v18, %v1018_v60  ;;  %v1055_v51 = vadd.f32 %v1953_v18, %v1019_v55  ;;  %v467_v31 = vadd.f32 %v436_v48, %v372_v56  ;;  %v468_v37 = vadd.f32 %v437_v25, %v373_v32 }
  0x48   : > { %3265 = vst [vmem:[#allocation37_spill] sm:$0xff] %v2142_v42  ;;  %v471_v42 = vadd.f32 %v440_v2, %v376_v1  ;;  %v501_v60 = vrot.slane %v2108_v36, 1  ;;  %v3183_v44 = vrot.slane %v2165_v45, 1  ;;  %v2181_v55 = vsel %vm514_vm3, %v3184_v23, %v498_v17 }
  0x49   : > { %3266 = vst [vmem:[#allocation38_spill] sm:$0xff] %v2152_v34  ;;  %v1086_v15 = vmax.f32 %v1054_v29, 0.0  ;;  %v1087_v57 = vmax.f32 %v1055_v51, 0.0  ;;  %v472_v56 = vadd.f32 %v441_v9, %v377_v43  ;;  %v529_v1 = vsel %vm514_vm3, %v498_v17, %v499_v0 }
  0x4a   : > { %3267 = vst [vmem:[#allocation39_spill] sm:$0xff] %v2165_v45  ;;  %v527_v32 = vsel %vm514_vm3, %v500_v38, %v501_v60  ;;  %v592_v48 = vmul.f32 %v1746_v7, %v2181_v55  ;;  %v525_v2 = vsel %vm514_vm3, %v502_v30, %v3183_v44  ;;  %v2195_v29 = vsel %vm514_vm3, %v499_v0, %v500_v38 }
  0x4b   : > { %3268 = vst [vmem:[#allocation40_spill] sm:$0xff] %v2181_v55  ;;  %v1114_v25 = vpack.c.bf16 %v1087_v57, %v1086_v15  ;;  %v2199_v43 = vsel %vm262_vm2, %v529_v1, 0.0  ;;  %v526_v9 = vsel %vm514_vm3, %v501_v60, %v502_v30  ;;  %v2205_v17 = vsel %vm262_vm2, %v527_v32, 0.0  ;;  %v2266_v55 = vld [vmem:[%s1758_s30 + $0xd8] sm:$0xff] }
  0x4c   : > { %3269 = vst [vmem:[#allocation41_spill] sm:$0xff] %v2195_v29  ;;  %v564_v15 = vsel %vm262_vm2, %v525_v2, 0.0  ;;  %v593_v57 = vmul.f32 %v1746_v7, %v2199_v43  ;;  %v2214_v38 = vmul.f32 %v1746_v7, %v2195_v29  ;;  %v596_v0 = vmul.f32 %v1746_v7, %v526_v9 }
  0x4d   : > { %3270 = vst [vmem:[#allocation42_spill] sm:$0xff] %v2199_v43  ;;  %1469 = vmatmul.msk.bf16.vlgmr.msra.gmra.mxu1 %vm1162_vm4, %v1114_v25  ;;  %v597_v30 = vmul.f32 %v1746_v7, %v564_v15  ;;  %v623_v51 = vadd.f32 %v592_v48, %v467_v31  ;;  %v2220_v60 = vmul.f32 %v1746_v7, %v2205_v17 }
  0x4e   : > { %3271 = vst [vmem:[#allocation43_spill] sm:$0xff] %v2205_v17  ;;  %v624_v32 = vadd.f32 %v593_v57, %v468_v37  ;;  %v662_v1 = vmul.f32 %v1823_v40, %v2152_v34  ;;  %v663_v25 = vmul.f32 %v1823_v40, %v2138_v14  ;;  %v2226_v2 = vadd.f32 %v596_v0, %v471_v42  ;;  %v2240_v42 = vld [vmem:[%s1758_s30 + $0xa8] sm:$0xff] }
  0x4f   : > { %3272 = vst [vmem:[#allocation44_spill] sm:$0xff] %v2214_v38  ;;  %v2228_v44 = vadd.f32 %v597_v30, %v472_v56  ;;  %v2231_v23 = vmul.f32 %v1823_v40, %v343_v28  ;;  %v728_v31 = vmul.f32 %v1842_v49, %v2105_v24  ;;  %v729_v57 = vmul.f32 %v1842_v49, %v2094_v22 }
  0x50   : > { %3273 = vst [vmem:[#allocation45_spill] sm:$0xff] %v2220_v60  ;;  %v694_v37 = vadd.f32 %v662_v1, %v623_v51  ;;  %v695_v48 = vadd.f32 %v663_v25, %v624_v32  ;;  %v799_v43 = vmul.f32 %v1860_v54, %v2195_v29  ;;  %v2244_v56 = vmul.f32 %v1823_v40, %v2134_v46  ;;  %v2253_v32 = vld [vmem:[%s1758_s30 + $0xb0] sm:$0xff]  ;;  %v2256_v1 = vld [vmem:[%s1758_s30 + $0xb8] sm:$0xff] }
  0x51   : > { %3274 = vst [vmem:[#allocation46_spill] sm:$0xff] %v2226_v2  ;;  %v800_v0 = vmul.f32 %v1860_v54, %v2205_v17  ;;  %v2249_v30 = vmul.f32 %v1860_v54, %v526_v9  ;;  %v865_v51 = vmul.f32 %v1869_v59, %v343_v28  ;;  %v930_v2 = vmul.f32 %v1879_v63, %v2108_v36  ;;  %v2263_v17 = vld [vmem:[%s1758_s30 + $0xc8] sm:$0xff] }
  0x52   : > { %3275 = vst [vmem:[#allocation47_spill] sm:$0xff] %v2228_v44  ;;  %v760_v25 = vadd.f32 %v728_v31, %v694_v37  ;;  %v761_v29 = vadd.f32 %v729_v57, %v695_v48  ;;  %v866_v44 = vmul.f32 %v1869_v59, %v2134_v46  ;;  %v931_v28 = vmul.f32 %v1879_v63, %v2102_v47  ;;  %v2274_v57 = vld [vmem:[%s1758_s30 + $0xc0] sm:$0xff]  ;;  %v2277_v46 = vld [vmem:[%s1758_s30 + $0xd0] sm:$0xff] }
  0x53   : > { %3276 = vst [vmem:[#allocation48_spill] sm:$0xff] %v2231_v23  ;;  %v995_v39 = vmul.f32 %v1891_v10, %v526_v9  ;;  %v285_v36 = vrot.slane %v2253_v32, 7  ;;  %v287_v23 = vrot.slane %v2274_v57, 7  ;;  %v288_v60 = vrot.slane %v2263_v17, 7 }
  0x54   : > { %3277 = vst [vmem:[#allocation49_spill] sm:$0xff] %v2240_v42  ;;  %v831_v37 = vadd.f32 %v799_v43, %v760_v25  ;;  %v832_v48 = vadd.f32 %v800_v0, %v761_v29  ;;  %v289_v9 = vrot.slane %v2277_v46, 7  ;;  %v3196_v38 = vrot.slane %v2266_v55, 7 }
  0x55   : > { %3278 = vst [vmem:[#allocation50_spill] sm:$0xff] %v2244_v56  ;;  %v286_v56 = vrot.slane %v2256_v1, 7  ;;  %v3284_v43 = vrot.slane %v2240_v42, 7  ;;  %v2294_v25 = vmul.f32 %v1860_v54, %v564_v15  ;;  %v507_v42 = vrot.slane %v2274_v57, 1 }
  0x56   : > { %3279 = vst [vmem:[#allocation51_spill] sm:$0xff] %v2249_v30  ;;  %v996_v30 = vmul.f32 %v1891_v10, %v564_v15  ;;  %v896_v22 = vadd.f32 %v865_v51, %v831_v37  ;;  %v897_v31 = vadd.f32 %v866_v44, %v832_v48  ;;  %v2300_v47 = vsel %vm294_vm1, %v289_v9, %v3196_v38 }
  0x57   : > { %3280 = vst [vmem:[#allocation52_spill] sm:$0xff] %v2256_v1  ;;  %v2287_v29 = vsel %vm294_vm1, %v285_v36, %v286_v56  ;;  %v302_v0 = vsel %vm294_vm1, %v3284_v43, %v285_v36  ;;  %v298_v44 = vsel %vm294_vm1, %v288_v60, %v289_v9  ;;  %v300_v51 = vsel %vm294_vm1, %v286_v56, %v287_v23 }
  0x58   : > { %3281 = vst [vmem:[#allocation53_spill] sm:$0xff] %v2274_v57  ;;  %v961_v37 = vadd.f32 %v930_v2, %v896_v22  ;;  %v962_v48 = vadd.f32 %v931_v28, %v897_v31  ;;  %v2308_v36 = vsel %vm294_vm1, %v287_v23, %v288_v60  ;;  %v2312_v15 = vsel %vm259_vm0, %v302_v0, 0.0 }
  0x59   : > { %3282 = vst [vmem:[#allocation54_spill] sm:$0xff] %v2277_v46  ;;  %v2316_v43 = vsel %vm259_vm0, %v300_v51, 0.0  ;;  %v351_v9 = vsel %vm259_vm0, %v298_v44, 0.0  ;;  %v380_v22 = vmul.f32 %v1732_v3, %v2312_v15  ;;  %v381_v2 = vmul.f32 %v1732_v3, %v2287_v29 }
  0x5a   : > { %3283 = vst [vmem:[#allocation55_spill] sm:$0xff] %v2287_v29  ;;  %v1026_v23 = vadd.f32 %v995_v39, %v961_v37  ;;  %v1027_v60 = vadd.f32 %v996_v30, %v962_v48  ;;  %v384_v56 = vmul.f32 %v1732_v3, %v351_v9  ;;  %v444_v28 = vmul.f32 %v1740_v5, %v2253_v32  ;;  %v2337_v30 = vld [vmem:[%s1758_s30 + $0xe0] sm:$0xff] }
  0x5b   : > { %3285 = vst [vmem:[#allocation56_spill] sm:$0xff] %v2294_v25  ;;  %v385_v31 = vmul.f32 %v1732_v3, %v2300_v47  ;;  %v445_v0 = vmul.f32 %v1740_v5, %v2256_v1  ;;  %v448_v44 = vmul.f32 %v1740_v5, %v2277_v46  ;;  %v449_v37 = vmul.f32 %v1740_v5, %v2266_v55 }
  0x5c   : > { %3286 = vst [vmem:[#allocation57_spill] sm:$0xff] %v2308_v36  ;;  %v1062_v38 = vadd.f32 %v1953_v18, %v1026_v23  ;;  %v1063_v39 = vadd.f32 %v1953_v18, %v1027_v60  ;;  %v506_v48 = vrot.slane %v2256_v1, 1  ;;  %v475_v29 = vadd.f32 %v444_v28, %v380_v22 }
  0x5d   : > { %3287 = vst [vmem:[#allocation58_spill] sm:$0xff] %v2312_v15  ;;  %v476_v15 = vadd.f32 %v445_v0, %v381_v2  ;;  %v479_v25 = vadd.f32 %v448_v44, %v384_v56  ;;  %v508_v51 = vrot.slane %v2263_v17, 1  ;;  %v509_v23 = vrot.slane %v2277_v46, 1 }
  0x5e   : > { %3288 = vst [vmem:[#allocation59_spill] sm:$0xff] %v2316_v43  ;;  %v1094_v24 = vmax.f32 %v1062_v38, 0.0  ;;  %v1095_v14 = vmax.f32 %v1063_v39, 0.0  ;;  %v510_v60 = vrot.slane %v2266_v55, 1  ;;  %v3212_v34 = vrot.slane %v2337_v30, 1 }
  0x5f   : > { %v521_v45 = vsel %vm514_vm3, %v506_v48, %v507_v42  ;;  %v3289_v1 = vrot.slane %v2253_v32, 1  ;;  %v480_v38 = vadd.f32 %v449_v37, %v385_v31  ;;  %v519_v56 = vsel %vm514_vm3, %v508_v51, %v509_v23 }
  0x60   : > { %v1118_v2 = vpack.c.bf16 %v1095_v14, %v1094_v24  ;;  %v2359_v28 = vsel %vm262_vm2, %v521_v45, 0.0  ;;  %v517_v0 = vsel %vm514_vm3, %v510_v60, %v3212_v34  ;;  %v518_v44 = vsel %vm514_vm3, %v509_v23, %v510_v60 }
  0x61   : > { %v2353_v22 = vsel %vm514_vm3, %v3289_v1, %v506_v48  ;;  %3291 = vst [vmem:[#allocation61_spill] sm:$0xff] %v2359_v28  ;;  %v2369_v1 = vsel %vm514_vm3, %v507_v42, %v508_v51  ;;  %v2376_v14 = vsel %vm262_vm2, %v519_v56, 0.0  ;;  %v572_v45 = vsel %vm262_vm2, %v517_v0, 0.0 }
  0x62   : > { %3290 = vst [vmem:[#allocation60_spill] sm:$0xff] %v2353_v22  ;;  %v600_v24 = vmul.f32 %v1746_v7, %v2353_v22  ;;  %1473 = vmatmul.msk.bf16.vlgmr.msra.gmra.mxu2 %vm1162_vm4, %v1118_v2  ;;  %v601_v31 = vmul.f32 %v1746_v7, %v2359_v28  ;;  %v2384_v39 = vmul.f32 %v1746_v7, %v2369_v1 }
  0x63   : > { %3292 = vst [vmem:[#allocation62_spill] sm:$0xff] %v2369_v1  ;;  %v604_v42 = vmul.f32 %v1746_v7, %v518_v44  ;;  %v605_v51 = vmul.f32 %v1746_v7, %v572_v45  ;;  %v670_v48 = vmul.f32 %v1823_v40, %v2316_v43  ;;  %v2392_v23 = vmul.f32 %v1746_v7, %v2376_v14 }
  0x64   : > { %3293 = vst [vmem:[#allocation63_spill] sm:$0xff] %v2376_v14  ;;  %v631_v37 = vadd.f32 %v600_v24, %v475_v29  ;;  %v632_v60 = vadd.f32 %v601_v31, %v476_v15  ;;  %v671_v2 = vmul.f32 %v1823_v40, %v2308_v36  ;;  %v2397_v56 = vmul.f32 %v1823_v40, %v351_v9 }
  0x65   : > { %v2399_v0 = vadd.f32 %v604_v42, %v479_v25  ;;  %v2401_v34 = vadd.f32 %v605_v51, %v480_v38  ;;  %v736_v29 = vmul.f32 %v1842_v49, %v2274_v57  ;;  %v737_v22 = vmul.f32 %v1842_v49, %v2263_v17 }
  0x66   : > { %3294 = vst [vmem:[#allocation64_spill] sm:$0xff] %v2397_v56  ;;  %v702_v28 = vadd.f32 %v670_v48, %v631_v37  ;;  %v703_v24 = vadd.f32 %v671_v2, %v632_v60  ;;  %v807_v15 = vmul.f32 %v1860_v54, %v2369_v1  ;;  %v808_v31 = vmul.f32 %v1860_v54, %v2376_v14 }
  0x67   : > { %3295 = vst [vmem:[#allocation65_spill] sm:$0xff] %v2399_v0  ;;  %v2413_v25 = vmul.f32 %v1823_v40, %v2300_v47  ;;  %v2416_v42 = vmul.f32 %v1860_v54, %v518_v44  ;;  %v873_v51 = vmul.f32 %v1869_v59, %v351_v9  ;;  %v874_v48 = vmul.f32 %v1869_v59, %v2300_v47 }
  0x68   : > { %3296 = vst [vmem:[#allocation66_spill] sm:$0xff] %v2401_v34  ;;  %v768_v38 = vadd.f32 %v736_v29, %v702_v28  ;;  %v769_v37 = vadd.f32 %v737_v22, %v703_v24  ;;  %v938_v60 = vmul.f32 %v1879_v63, %v2277_v46  ;;  %v939_v2 = vmul.f32 %v1879_v63, %v2266_v55 }
  0x69   : > { %3297 = vst [vmem:[#allocation67_spill] sm:$0xff] %v2413_v25  ;;  %v1003_v1 = vmul.f32 %v1891_v10, %v518_v44  ;;  %v1004_v28 = vmul.f32 %v1891_v10, %v572_v45  ;;  %v267_v29 = vrot.slane %v1791_v26, 7  ;;  %v422_v9 = vmul.f32 %v1740_v5, %v1763_v11 }
  0x6a   : > { %3298 = vst [vmem:[#allocation68_spill] sm:$0xff] %v2416_v42  ;;  %v839_v14 = vadd.f32 %v807_v15, %v768_v38  ;;  %v840_v34 = vadd.f32 %v808_v31, %v769_v37  ;;  %v423_v47 = vmul.f32 %v1740_v5, %v1766_v12  ;;  %v426_v22 = vmul.f32 %v1740_v5, %v1791_v26 }
  0x6b   : > { %v3299_v0 = vrot.slane %v1845_v50, 7  ;;  %v3300_v15 = vrot.slane %v1775_v16, 7  ;;  %v427_v38 = vmul.f32 %v1740_v5, %v1845_v50  ;;  %v488_v46 = vrot.slane %v1845_v50, 1 }
  0x6c   : > { %v904_v24 = vadd.f32 %v873_v51, %v839_v14  ;;  %v905_v37 = vadd.f32 %v874_v48, %v840_v34  ;;  %v453_v14 = vadd.f32 %v422_v9, %v1826_v41  ;;  %v3301_v56 = vrot.slane %v1898_v20, 1 }
  0x6d   : > { %v319_v44 = vsel %vm294_vm1, %v267_v29, %v3299_v0  ;;  %v320_v31 = vsel %vm294_vm1, %v3300_v15, %v267_v29  ;;  %v454_v0 = vadd.f32 %v423_v47, %v1813_v35  ;;  %v2452_v29 = vmul.f32 %v1860_v54, %v572_v45 }
  0x6e   : > { %v329_v12 = vsel %vm259_vm0, %v320_v31, 0.0  ;;  %v363_v11 = vmul.f32 %v1732_v3, %v319_v44  ;;  %v969_v51 = vadd.f32 %v938_v60, %v904_v24  ;;  %v970_v15 = vadd.f32 %v939_v2, %v905_v37 }
  0x6f   : > { %v362_v42 = vmul.f32 %v1732_v3, %v329_v12  ;;  %v609_v34 = vadd.f32 %v1852_v52, %v453_v14  ;;  %v539_v41 = vsel %vm514_vm3, %v488_v46, %v3301_v56  ;;  %v3302_v60 = vrot.slane %v1791_v26, 1 }
  0x70   : > { %v458_v25 = vadd.f32 %v427_v38, %v363_v11  ;;  %v1034_v48 = vadd.f32 %v1003_v1, %v969_v51  ;;  %v1035_v9 = vadd.f32 %v1004_v28, %v970_v15  ;;  %v550_v45 = vsel %vm262_vm2, %v539_v41, 0.0  ;;  %v3305_v41 = vld [vmem:[#allocation11_spill] sm:$0xff] }
  0x71   : > { %v457_v31 = vadd.f32 %v426_v22, %v362_v42  ;;  %v540_v35 = vsel %vm514_vm3, %v3302_v60, %v488_v46  ;;  %v610_v52 = vadd.f32 %v1855_v53, %v454_v0  ;;  %v583_v20 = vmul.f32 %v1746_v7, %v550_v45  ;;  %v3306_v60 = vld [vmem:[#allocation9_spill] sm:$0xff] }
  0x72   : > { %v582_v11 = vmul.f32 %v1746_v7, %v540_v35  ;;  %v1070_v1 = vadd.f32 %v1953_v18, %v1034_v48  ;;  %v2470_v42 = vmul.f32 %v1823_v40, %v329_v12  ;;  %v680_v56 = vadd.f32 %v1874_v62, %v609_v34 }
  0x73   : > { %v1071_v2 = vadd.f32 %v1953_v18, %v1035_v9  ;;  %v681_v28 = vadd.f32 %v1901_v21, %v610_v52  ;;  %v714_v47 = vmul.f32 %v1842_v49, %v1769_v13  ;;  %v2479_v53 = vadd.f32 %v583_v20, %v458_v25  ;;  %v3309_v20 = vld [vmem:[#allocation10_spill] sm:$0xff] }
  0x74   : > { %v2474_v46 = vadd.f32 %v582_v11, %v457_v31  ;;  %v1102_v22 = vmax.f32 %v1070_v1, 0.0  ;;  %v2482_v24 = vmul.f32 %v1823_v40, %v319_v44  ;;  %v715_v38 = vmul.f32 %v1842_v49, %v1775_v16  ;;  %v3307_v11 = vld [vmem:[#allocation28_spill] sm:$0xff] }
  0x75   : > { %3304 = vst [vmem:[#allocation70_spill] sm:$0xff] %v2479_v53  ;;  %v1103_v37 = vmax.f32 %v1071_v2, 0.0  ;;  %v746_v62 = vadd.f32 %v714_v47, %v680_v56  ;;  %v2487_v14 = vmul.f32 %v1860_v54, %v540_v35  ;;  %v851_v51 = vmul.f32 %v1869_v59, %v329_v12 }
  0x76   : > { %3303 = vst [vmem:[#allocation69_spill] sm:$0xff] %v2474_v46  ;;  %v747_v21 = vadd.f32 %v715_v38, %v681_v28  ;;  %v852_v0 = vmul.f32 %v1869_v59, %v319_v44  ;;  %v916_v13 = vmul.f32 %v1879_v63, %v1791_v26  ;;  %v917_v25 = vmul.f32 %v1879_v63, %v1845_v50  ;;  %v3358_v46 = vld [vmem:[#allocation25_spill] sm:$0xff] }
  0x77   : > { %v1122_v15 = vpack.c.bf16 %v1103_v37, %v1102_v22  ;;  %v817_v34 = vadd.f32 %v1904_v27, %v746_v62  ;;  %v981_v16 = vmul.f32 %v1891_v10, %v540_v35  ;;  %v982_v48 = vmul.f32 %v1891_v10, %v550_v45 }
  0x78   : > { %v818_v31 = vadd.f32 %v1914_v33, %v747_v21  ;;  %v275_v12 = vrot.slane %v1989_v58, 7  ;;  %v366_v44 = vmul.f32 %v1732_v3, %v1998_v19  ;;  %v367_v26 = vmul.f32 %v1732_v3, %v1944_v6  ;;  %v3331_v6 = vld [vmem:[#allocation44_spill] sm:$0xff] }
  0x79   : > { %1477 = vmatmul.msk.bf16.vlgmr.msra.gmra.mxu3 %vm1162_vm4, %v1122_v15  ;;  %v882_v50 = vadd.f32 %v851_v51, %v817_v34  ;;  %v430_v27 = vmul.f32 %v1740_v5, %v3305_v41  ;;  %v431_v35 = vmul.f32 %v1740_v5, %v3306_v60  ;;  %v434_v33 = vmul.f32 %v1740_v5, %v1989_v58 }
  0x7a   : > { %v883_v9 = vadd.f32 %v852_v0, %v818_v31  ;;  %v3308_v52 = vrot.slane %v3307_v11, 7  ;;  %v3310_v56 = vrot.slane %v3309_v20, 7  ;;  %v435_v28 = vmul.f32 %v1740_v5, %v3307_v11 }
  0x7b   : > { %v947_v47 = vadd.f32 %v916_v13, %v882_v50  ;;  %v461_v37 = vadd.f32 %v430_v27, %v366_v44  ;;  %v462_v21 = vadd.f32 %v431_v35, %v367_v26  ;;  %v496_v0 = vrot.slane %v3307_v11, 1  ;;  %v3314_v27 = vld [vmem:[#allocation22_spill] sm:$0xff] }
  0x7c   : > { %v311_v1 = vsel %vm294_vm1, %v275_v12, %v3308_v52  ;;  %v312_v2 = vsel %vm294_vm1, %v3310_v56, %v275_v12  ;;  %v948_v62 = vadd.f32 %v917_v25, %v883_v9  ;;  %v2527_v15 = vmul.f32 %v1860_v54, %v550_v45  ;;  %v3311_v12 = vld [vmem:[#allocation21_spill] sm:$0xff]  ;;  %v3315_v52 = vld [vmem:[#allocation24_spill] sm:$0xff] }
  0x7d   : > { %v337_v22 = vsel %vm259_vm0, %v312_v2, 0.0  ;;  %v371_v38 = vmul.f32 %v1732_v3, %v311_v1  ;;  %v1012_v34 = vadd.f32 %v981_v16, %v947_v47  ;;  %v617_v41 = vadd.f32 %v3311_v12, %v461_v37  ;;  %v3316_v47 = vld [vmem:[#allocation26_spill] sm:$0xff]  ;;  %v3317_v37 = vld [vmem:[#allocation12_spill] sm:$0xff] }
  0x7e   : > { %v370_v51 = vmul.f32 %v1732_v3, %v337_v22  ;;  %v1013_v13 = vadd.f32 %v982_v48, %v948_v62  ;;  %v3312_v60 = vrot.slane %v2081_v61, 1  ;;  %v3313_v25 = vrot.slane %v1989_v58, 1 }
  0x7f   : > { %v466_v31 = vadd.f32 %v435_v28, %v371_v38  ;;  %v1048_v26 = vadd.f32 %v1953_v18, %v1012_v34  ;;  %v618_v48 = vadd.f32 %v3314_v27, %v462_v21  ;;  %v2546_v9 = vmul.f32 %v1823_v40, %v337_v22  ;;  %v3321_v27 = vld [vmem:[#allocation39_spill] sm:$0xff] }
  0x80   : > { %v465_v50 = vadd.f32 %v434_v33, %v370_v51  ;;  %v531_v44 = vsel %vm514_vm3, %v496_v0, %v3312_v60  ;;  %v532_v3 = vsel %vm514_vm3, %v3313_v25, %v496_v0  ;;  %v1049_v35 = vadd.f32 %v1953_v18, %v1013_v13 }
  0x81   : > { %v558_v45 = vsel %vm262_vm2, %v531_v44, 0.0  ;;  %v590_v16 = vmul.f32 %v1746_v7, %v532_v3  ;;  %v688_v56 = vadd.f32 %v3315_v52, %v617_v41  ;;  %v1080_v2 = vmax.f32 %v1048_v26, 0.0 }
  0x82   : > { %v591_v33 = vmul.f32 %v1746_v7, %v558_v45  ;;  %v2550_v28 = vmul.f32 %v1823_v40, %v311_v1  ;;  %v689_v38 = vadd.f32 %v3316_v47, %v618_v48  ;;  %v722_v62 = vmul.f32 %v1842_v49, %v3317_v37  ;;  %v3326_v37 = vld [vmem:[#allocation49_spill] sm:$0xff] }
  0x83   : > { %v1081_v51 = vmax.f32 %v1049_v35, 0.0  ;;  %v2555_v21 = vadd.f32 %v590_v16, %v465_v50  ;;  %v723_v7 = vmul.f32 %v1842_v49, %v3309_v20  ;;  %v2562_v12 = vmul.f32 %v1860_v54, %v532_v3  ;;  %v3320_v50 = vld [vmem:[#allocation27_spill] sm:$0xff]  ;;  %v2579_v35 = vld [vmem:[%s3147_s1] ss:$0 sm:$0xff] }
  0x84   : > { %v2557_v0 = vadd.f32 %v591_v33, %v466_v31  ;;  %v754_v34 = vadd.f32 %v722_v62, %v688_v56  ;;  %v859_v41 = vmul.f32 %v1869_v59, %v337_v22  ;;  %v860_v13 = vmul.f32 %v1869_v59, %v311_v1  ;;  %v3322_v22 = vld [vmem:[#allocation30_spill] sm:$0xff]  ;;  %v3324_v56 = vld [vmem:[#allocation36_spill] sm:$0xff] }
  0x85   : > { %3318 = vst [vmem:[#allocation11_spill] sm:$0xff] %v2555_v21  ;;  %v1111_v60 = vpack.c.bf16 %v1081_v51, %v1080_v2  ;;  %v755_v44 = vadd.f32 %v723_v7, %v689_v38  ;;  %v924_v25 = vmul.f32 %v1879_v63, %v1989_v58  ;;  %v925_v31 = vmul.f32 %v1879_v63, %v3307_v11  ;;  %v3323_v33 = vld [vmem:[#allocation38_spill] sm:$0xff]  ;;  %v3328_v7 = vld [vmem:[#allocation32_spill] sm:$0xff] }
  0x86   : > { %3319 = vst [vmem:[#allocation9_spill] sm:$0xff] %v2557_v0  ;;  %v825_v26 = vadd.f32 %v3320_v50, %v754_v34  ;;  %v989_v20 = vmul.f32 %v1891_v10, %v532_v3  ;;  %v990_v16 = vmul.f32 %v1891_v10, %v558_v45  ;;  %v283_v48 = vrot.slane %v3321_v27, 7  ;;  %v3325_v3 = vld [vmem:[#allocation33_spill] sm:$0xff]  ;;  %v3330_v50 = vld [vmem:[#allocation31_spill] sm:$0xff] }
  0x87   : > { %1466 = vmatmul.msk.bf16.gmra.mxu0 %vm1162_vm4, %v1111_v60  ;;  %v826_v1 = vadd.f32 %v3322_v22, %v755_v44  ;;  %v374_v52 = vmul.f32 %v2579_v35, %v3323_v33  ;;  %v375_v2 = vmul.f32 %v2579_v35, %v3324_v56  ;;  %v438_v47 = vmul.f32 %v1740_v5, %v3325_v3  ;;  %v2598_v44 = vld [vmem:[%s3147_s1 + $0x1] ss:$0 sm:$0xff] }
  0x88   : > { %v890_v38 = vadd.f32 %v859_v41, %v825_v26  ;;  %v3327_v62 = vrot.slane %v3326_v37, 7  ;;  %v3329_v34 = vrot.slane %v3328_v7, 7  ;;  %v439_v22 = vmul.f32 %v2598_v44, %v3330_v50 }
  0x89   : > { %v891_v5 = vadd.f32 %v860_v13, %v826_v1  ;;  %v442_v3 = vmul.f32 %v2598_v44, %v3321_v27  ;;  %v469_v56 = vadd.f32 %v438_v47, %v374_v52  ;;  %v2611_v33 = vmul.f32 %v1860_v54, %v558_v45 }
  0x8a   : > { %v303_v51 = vsel %vm294_vm1, %v283_v48, %v3327_v62  ;;  %v304_v60 = vsel %vm294_vm1, %v3329_v34, %v283_v48  ;;  %v955_v62 = vadd.f32 %v924_v25, %v890_v38  ;;  %v443_v34 = vmul.f32 %v2598_v44, %v3326_v37 }
  0x8b   : > { %v345_v41 = vsel %vm259_vm0, %v304_v60, 0.0  ;;  %v379_v26 = vmul.f32 %v2579_v35, %v303_v51  ;;  %v956_v50 = vadd.f32 %v925_v31, %v891_v5  ;;  %v470_v13 = vadd.f32 %v439_v22, %v375_v2  ;;  %v3334_v31 = vld [vmem:[#allocation45_spill] sm:$0xff] }
  0x8c   : > { %v378_v48 = vmul.f32 %v2579_v35, %v345_v41  ;;  %v504_v1 = vrot.slane %v3326_v37, 1  ;;  %v1020_v60 = vadd.f32 %v989_v20, %v955_v62  ;;  %v625_v19 = vadd.f32 %v3331_v6, %v469_v56  ;;  %v2630_v6 = vld [vmem:[%s3147_s1 + $0x2] ss:$0 sm:$0xff]  ;;  %v3336_v62 = vld [vmem:[#allocation50_spill] sm:$0xff] }
  0x8d   : > { %v474_v21 = vadd.f32 %v443_v34, %v379_v26  ;;  %v1021_v53 = vadd.f32 %v990_v16, %v956_v50  ;;  %v3332_v25 = vrot.slane %v2253_v32, 1  ;;  %v3333_v52 = vrot.slane %v3321_v27, 1  ;;  %v3335_v26 = vld [vmem:[#allocation48_spill] sm:$0xff] }
  0x8e   : > { %v473_v0 = vadd.f32 %v442_v3, %v378_v48  ;;  %v626_v2 = vadd.f32 %v3334_v31, %v470_v13  ;;  %v1056_v47 = vadd.f32 %v1953_v18, %v1020_v60  ;;  %v2634_v56 = vmul.f32 %v1823_v40, %v345_v41  ;;  %v3337_v13 = vld [vmem:[#allocation34_spill] sm:$0xff] }
  0x8f   : > { %v523_v38 = vsel %vm514_vm3, %v504_v1, %v3332_v25  ;;  %v524_v45 = vsel %vm514_vm3, %v3333_v52, %v504_v1  ;;  %v1057_v22 = vadd.f32 %v1953_v18, %v1021_v53  ;;  %v696_v3 = vadd.f32 %v3335_v26, %v625_v19 }
  0x90   : > { %v566_v20 = vsel %vm262_vm2, %v523_v38, 0.0  ;;  %v598_v16 = vmul.f32 %v2630_v6, %v524_v45  ;;  %v697_v48 = vadd.f32 %v3336_v62, %v626_v2  ;;  %v1088_v34 = vmax.f32 %v1056_v47, 0.0  ;;  %v2657_v47 = vld [vmem:[%s1758_s30 + $0xe8] sm:$0xff] }
  0x91   : > { %v599_v5 = vmul.f32 %v2630_v6, %v566_v20  ;;  %v2641_v50 = vmul.f32 %v1823_v40, %v303_v51  ;;  %v730_v1 = vmul.f32 %v1842_v49, %v3337_v13  ;;  %v731_v60 = vmul.f32 %v1842_v49, %v3328_v7 }
  0x92   : > { %v1089_v25 = vmax.f32 %v1057_v22, 0.0  ;;  %v2647_v38 = vadd.f32 %v598_v16, %v473_v0  ;;  %v2652_v52 = vmul.f32 %v1860_v54, %v524_v45  ;;  %v867_v2 = vmul.f32 %v1869_v59, %v345_v41  ;;  %v3340_v54 = vld [vmem:[#allocation51_spill] sm:$0xff]  ;;  %v3341_v16 = vld [vmem:[#allocation56_spill] sm:$0xff] }
  0x93   : > { %v2649_v53 = vadd.f32 %v599_v5, %v474_v21  ;;  %v762_v19 = vadd.f32 %v730_v1, %v696_v3  ;;  %v763_v31 = vadd.f32 %v731_v60, %v697_v48  ;;  %v868_v40 = vmul.f32 %v1869_v59, %v303_v51  ;;  %v2677_v48 = vld [vmem:[%s1758_s30 + $0xf0] sm:$0xff] }
  0x94   : > { %3338 = vst [vmem:[#allocation28_spill] sm:$0xff] %v2647_v38  ;;  %v1115_v26 = vpack.c.bf16 %v1089_v25, %v1088_v34  ;;  %v932_v49 = vmul.f32 %v1879_v63, %v3321_v27  ;;  %v933_v21 = vmul.f32 %v1879_v63, %v3326_v37  ;;  %v997_v0 = vmul.f32 %v1891_v10, %v524_v45 }
  0x95   : > { %3339 = vst [vmem:[#allocation10_spill] sm:$0xff] %v2649_v53  ;;  %v833_v7 = vadd.f32 %v3340_v54, %v762_v19  ;;  %v834_v22 = vadd.f32 %v3341_v16, %v763_v31  ;;  %v998_v41 = vmul.f32 %v1891_v10, %v566_v20  ;;  %v291_v59 = vrot.slane %v2337_v30, 7  ;;  %v3357_v53 = vld [vmem:[#allocation23_spill] sm:$0xff] }
  0x96   : > { %1470 = vmatmul.msk.bf16.gmra.mxu1 %vm1162_vm4, %v1115_v26  ;;  %v3224_v51 = vrot.slane %v2657_v47, 7  ;;  %v382_v5 = vmul.f32 %v2579_v35, %v2316_v43  ;;  %v383_v63 = vmul.f32 %v2579_v35, %v2308_v36  ;;  %v446_v45 = vmul.f32 %v2598_v44, %v2274_v57  ;;  %v3356_v36 = vld [vmem:[#allocation19_spill] sm:$0xff] }
  0x97   : > { %v898_v3 = vadd.f32 %v867_v2, %v833_v7  ;;  %v899_v62 = vadd.f32 %v868_v40, %v834_v22  ;;  %v3342_v10 = vrot.slane %v2266_v55, 7  ;;  %v447_v13 = vmul.f32 %v2598_v44, %v2263_v17  ;;  %v2702_v22 = vld [vmem:[%s3147_s1 + $0x5] ss:$0 sm:$0xff] }
  0x98   : > { %v295_v1 = vsel %vm294_vm1, %v291_v59, %v3224_v51  ;;  %v450_v25 = vmul.f32 %v2598_v44, %v2337_v30  ;;  %v451_v19 = vmul.f32 %v2598_v44, %v2657_v47  ;;  %v477_v26 = vadd.f32 %v446_v45, %v382_v5 }
  0x99   : > { %v296_v34 = vsel %vm294_vm1, %v3342_v10, %v291_v59  ;;  %v963_v31 = vadd.f32 %v932_v49, %v898_v3  ;;  %v964_v2 = vadd.f32 %v933_v21, %v899_v62  ;;  %v387_v17 = vmul.f32 %v2579_v35, %v295_v1 }
  0x9a   : > { %v353_v60 = vsel %vm259_vm0, %v296_v34, 0.0  ;;  %v478_v54 = vadd.f32 %v447_v13, %v383_v63  ;;  %v512_v7 = vrot.slane %v2657_v47, 1  ;;  %v3223_v16 = vrot.slane %v2677_v48, 1  ;;  %v3344_v13 = vld [vmem:[#allocation64_spill] sm:$0xff] }
  0x9b   : > { %v386_v40 = vmul.f32 %v2579_v35, %v353_v60  ;;  %v2705_v59 = vmul.f32 %v2702_v22, %v566_v20  ;;  %v1028_v44 = vadd.f32 %v997_v0, %v963_v31  ;;  %v1029_v49 = vadd.f32 %v998_v41, %v964_v2 }
  0x9c   : > { %v515_v35 = vsel %vm514_vm3, %v512_v7, %v3223_v16  ;;  %v3343_v5 = vrot.slane %v2337_v30, 1  ;;  %v633_v45 = vadd.f32 %v2384_v39, %v477_v26  ;;  %v634_v3 = vadd.f32 %v2392_v23, %v478_v54  ;;  %v2730_v39 = vld [vmem:[%s3147_s1 + $0x3] ss:$0 sm:$0xff]  ;;  %v3347_v26 = vld [vmem:[#allocation54_spill] sm:$0xff] }
  0x9d   : > { %v481_v21 = vadd.f32 %v450_v25, %v386_v40  ;;  %v1064_v20 = vadd.f32 %v1953_v18, %v1028_v44  ;;  %v1065_v0 = vadd.f32 %v1953_v18, %v1029_v49  ;;  %v574_v41 = vsel %vm262_vm2, %v515_v35, 0.0  ;;  %v1566_v16 = vld [vmem:[%s1758_s30 + $0x28] sm:$0xff] }
  0x9e   : > { %v516_v63 = vsel %vm514_vm3, %v3343_v5, %v512_v7  ;;  %v2722_v10 = vadd.f32 %v451_v19, %v387_v17  ;;  %v2725_v34 = vmul.f32 %v2630_v6, %v574_v41  ;;  %v2733_v23 = vmul.f32 %v2730_v39, %v353_v60  ;;  %v3345_v19 = vld [vmem:[#allocation67_spill] sm:$0xff] }
  0x9f   : > { %v606_v62 = vmul.f32 %v2630_v6, %v516_v63  ;;  %v704_v18 = vadd.f32 %v3344_v13, %v633_v45  ;;  %v1096_v25 = vmax.f32 %v1064_v20, 0.0  ;;  %v1097_v31 = vmax.f32 %v1065_v0, 0.0  ;;  %v2745_v6 = vld [vmem:[%s3147_s1 + $0x4] ss:$0 sm:$0xff]  ;;  %v2767_v20 = vld [vmem:[%s3147_s1 + $0x7] ss:$0 sm:$0xff] }
  0xa0   : > { %v2737_v2 = vmul.f32 %v2730_v39, %v295_v1  ;;  %v705_v40 = vadd.f32 %v3345_v19, %v634_v3  ;;  %v738_v54 = vmul.f32 %v2745_v6, %v3347_v26  ;;  %v739_v7 = vmul.f32 %v2745_v6, %v2266_v55 }
  0xa1   : > { %v2740_v17 = vadd.f32 %v606_v62, %v481_v21  ;;  %v2752_v44 = vmul.f32 %v2702_v22, %v516_v63  ;;  %v1119_v49 = vpack.c.bf16 %v1097_v31, %v1096_v25  ;;  %v2755_v35 = vmul.f32 %v2702_v22, %v574_v41  ;;  %v2760_v21 = vld [vmem:[%s3147_s1 + $0x6] ss:$0 sm:$0xff]  ;;  %v3349_v31 = vld [vmem:[#allocation8_spill] sm:$0xff] }
  0xa2   : > { %v875_v5 = vmul.f32 %v2760_v21, %v353_v60  ;;  %v876_v45 = vmul.f32 %v2760_v21, %v295_v1  ;;  %v770_v3 = vadd.f32 %v738_v54, %v704_v18  ;;  %v771_v55 = vadd.f32 %v739_v7, %v705_v40  ;;  %v2777_v1 = vld [vmem:[%s3147_s1 + $0x8] ss:$0 sm:$0xff]  ;;  %v3348_v18 = vld [vmem:[#allocation7_spill] sm:$0xff]  ;;  %v3350_v40 = vld [vmem:[#allocation68_spill] sm:$0xff] }
  0xa3   : > { %3346 = vst [vmem:[#allocation21_spill] sm:$0xff] %v2740_v17  ;;  %v940_v0 = vmul.f32 %v2767_v20, %v2337_v30  ;;  %v941_v62 = vmul.f32 %v2767_v20, %v2657_v47  ;;  %1474 = vmatmul.msk.bf16.gmra.mxu2 %vm1162_vm4, %v1119_v49  ;;  %v1005_v60 = vmul.f32 %v2777_v1, %v516_v63  ;;  %v1565_v7 = vld [vmem:[%s1758_s30 + $0x20] sm:$0xff]  ;;  %v3351_v17 = vld [vmem:[#allocation15_spill] sm:$0xff] }
  0xa4   : > { %v1006_v13 = vmul.f32 %v2777_v1, %v574_v41  ;;  %v682_v25 = vadd.f32 %v2470_v42, %v3348_v18  ;;  %v683_v19 = vadd.f32 %v2482_v24, %v3349_v31  ;;  %v841_v26 = vadd.f32 %v3350_v40, %v770_v3  ;;  %v3352_v41 = vld [vmem:[#allocation14_spill] sm:$0xff]  ;;  %v2796_v42 = vld [vmem:[%s1758_s30 + $0x30] sm:$0xff]  ;;  %v2801_v3 = vld [vmem:[%s1758_s30 + $0x38] sm:$0xff] }
  0xa5   : > { %v842_v54 = vadd.f32 %v2452_v29, %v771_v55  ;;  %v716_v49 = vmul.f32 %v1565_v7, %v2745_v6  ;;  %v717_v51 = vmul.f32 %v1566_v16, %v2745_v6  ;;  %v853_v63 = vmul.f32 %v2760_v21, %v3351_v17  ;;  %3353 = vst [vmem:[#allocation22_spill] sm:$0xff] %v2796_v42  ;;  %v3355_v40 = vld [vmem:[#allocation18_spill] sm:$0xff] }
  0xa6   : > { %v854_v57 = vmul.f32 %v2760_v21, %v3352_v41  ;;  %v918_v24 = vmul.f32 %v2796_v42, %v2767_v20  ;;  %3354 = vst [vmem:[#allocation24_spill] sm:$0xff] %v2801_v3  ;;  %v919_v29 = vmul.f32 %v2801_v3, %v2767_v20  ;;  %v906_v55 = vadd.f32 %v875_v5, %v841_v26  ;;  %v3360_v26 = vld [vmem:[#allocation35_spill] sm:$0xff] }
  0xa7   : > { %v907_v18 = vadd.f32 %v876_v45, %v842_v54  ;;  %v748_v31 = vadd.f32 %v716_v49, %v682_v25  ;;  %v749_v16 = vadd.f32 %v717_v51, %v683_v19  ;;  %v983_v7 = vmul.f32 %v2777_v1, %v3355_v40  ;;  %v3359_v25 = vld [vmem:[#allocation37_spill] sm:$0xff] }
  0xa8   : > { %v984_v43 = vmul.f32 %v2777_v1, %v3356_v36  ;;  %v690_v38 = vadd.f32 %v2546_v9, %v3357_v53  ;;  %v691_v42 = vadd.f32 %v2550_v28, %v3358_v46  ;;  %v971_v41 = vadd.f32 %v940_v0, %v906_v55  ;;  %v3361_v54 = vld [vmem:[#allocation29_spill] sm:$0xff] }
  0xa9   : > { %v972_v17 = vadd.f32 %v941_v62, %v907_v18  ;;  %v819_v3 = vadd.f32 %v2487_v14, %v748_v31  ;;  %v820_v5 = vadd.f32 %v2527_v15, %v749_v16  ;;  %v724_v51 = vmul.f32 %v2745_v6, %v1989_v58 }
  0xaa   : > { %v725_v45 = vmul.f32 %v2745_v6, %v3307_v11  ;;  %v861_v19 = vmul.f32 %v2760_v21, %v3359_v25  ;;  %v862_v9 = vmul.f32 %v2760_v21, %v3360_v26  ;;  %v1036_v53 = vadd.f32 %v1005_v60, %v971_v41  ;;  %v2830_v11 = vld [vmem:[%s3148_s2] ss:$0 sm:$0xff]  ;;  %v3363_v41 = vld [vmem:[#allocation42_spill] sm:$0xff] }
  0xab   : > { %v1037_v46 = vadd.f32 %v1006_v13, %v972_v17  ;;  %v884_v28 = vadd.f32 %v853_v63, %v819_v3  ;;  %v885_v0 = vadd.f32 %v854_v57, %v820_v5  ;;  %v756_v62 = vadd.f32 %v724_v51, %v690_v38  ;;  %v3362_v63 = vld [vmem:[#allocation40_spill] sm:$0xff]  ;;  %v3364_v51 = vld [vmem:[#allocation46_spill] sm:$0xff] }
  0xac   : > { %v757_v14 = vadd.f32 %v725_v45, %v691_v42  ;;  %v926_v15 = vmul.f32 %v2767_v20, %v2081_v61  ;;  %v927_v58 = vmul.f32 %v2767_v20, %v3361_v54  ;;  %v1072_v49 = vadd.f32 %v2830_v11, %v1036_v53 }
  0xad   : > { %v1073_v60 = vadd.f32 %v2830_v11, %v1037_v46  ;;  %v949_v17 = vadd.f32 %v918_v24, %v884_v28  ;;  %v950_v13 = vadd.f32 %v919_v29, %v885_v0  ;;  %v827_v57 = vadd.f32 %v2562_v12, %v756_v62  ;;  %v3365_v29 = vld [vmem:[#allocation47_spill] sm:$0xff] }
  0xae   : > { %v828_v38 = vadd.f32 %v2611_v33, %v757_v14  ;;  %v991_v61 = vmul.f32 %v2777_v1, %v3362_v63  ;;  %v992_v42 = vmul.f32 %v2777_v1, %v3363_v41  ;;  %v1104_v3 = vmax.f32 %v1072_v49, 0.0  ;;  %v3367_v62 = vld [vmem:[#allocation55_spill] sm:$0xff] }
  0xaf   : > { %v1105_v55 = vmax.f32 %v1073_v60, 0.0  ;;  %v1014_v18 = vadd.f32 %v983_v7, %v949_v17  ;;  %v1015_v31 = vadd.f32 %v984_v43, %v950_v13  ;;  %v892_v16 = vadd.f32 %v861_v19, %v827_v57  ;;  %v3366_v7 = vld [vmem:[#allocation58_spill] sm:$0xff]  ;;  %v3369_v13 = vld [vmem:[#allocation60_spill] sm:$0xff] }
  0xb0   : > { %v893_v5 = vadd.f32 %v862_v9, %v828_v38  ;;  %v698_v24 = vadd.f32 %v2634_v56, %v3364_v51  ;;  %v699_v12 = vadd.f32 %v2641_v50, %v3365_v29  ;;  %v732_v46 = vmul.f32 %v2745_v6, %v3321_v27 }
  0xb1   : > { %v1123_v45 = vpack.c.bf16 %v1105_v55, %v1104_v3  ;;  %v1050_v33 = vadd.f32 %v2830_v11, %v1014_v18  ;;  %v1051_v53 = vadd.f32 %v2830_v11, %v1015_v31  ;;  %v957_v28 = vadd.f32 %v926_v15, %v892_v16  ;;  %v3371_v31 = vld [vmem:[#allocation65_spill] sm:$0xff] }
  0xb2   : > { %v958_v0 = vadd.f32 %v927_v58, %v893_v5  ;;  %v733_v43 = vmul.f32 %v2745_v6, %v3326_v37  ;;  %v869_v19 = vmul.f32 %v2760_v21, %v3366_v7  ;;  %v764_v9 = vadd.f32 %v732_v46, %v698_v24  ;;  %v3368_v58 = vld [vmem:[#allocation52_spill] sm:$0xff]  ;;  %v3372_v5 = vld [vmem:[#allocation66_spill] sm:$0xff] }
  0xb3   : > { %1478 = vmatmul.msk.bf16.gmra.mxu3 %vm1162_vm4, %v1123_v45  ;;  %v1082_v56 = vmax.f32 %v1050_v33, 0.0  ;;  %v1083_v50 = vmax.f32 %v1051_v53, 0.0  ;;  %v870_v14 = vmul.f32 %v2760_v21, %v3367_v62  ;;  %v1022_v54 = vadd.f32 %v991_v61, %v957_v28  ;;  %v3373_v33 = vld [vmem:[#allocation6_spill] sm:$0xff] }
  0xb4   : > { %v1023_v49 = vadd.f32 %v992_v42, %v958_v0  ;;  %v765_v60 = vadd.f32 %v733_v43, %v699_v12  ;;  %v934_v27 = vmul.f32 %v2767_v20, %v2253_v32  ;;  %v835_v37 = vadd.f32 %v2652_v52, %v764_v9  ;;  %v3370_v42 = vld [vmem:[#allocation61_spill] sm:$0xff] }
  0xb5   : > { %v1112_v15 = vpack.c.bf16 %v1083_v50, %v1082_v56  ;;  %v935_v17 = vmul.f32 %v2767_v20, %v3368_v58  ;;  %v999_v57 = vmul.f32 %v2777_v1, %v3369_v13  ;;  %v1058_v38 = vadd.f32 %v2830_v11, %v1022_v54 }
  0xb6   : > { %v1059_v3 = vadd.f32 %v2830_v11, %v1023_v49  ;;  %v836_v61 = vadd.f32 %v2705_v59, %v765_v60  ;;  %v1000_v55 = vmul.f32 %v2777_v1, %v3370_v42  ;;  %v900_v18 = vadd.f32 %v869_v19, %v835_v37  ;;  %v2896_v49 = vld [vmem:[%s1758_s30 + $0xf8] sm:$0xff] }
  0xb7   : > { %1467 = vmatmul.msk.bf16.gmra.mxu0 %vm1162_vm4, %v1112_v15  ;;  %v639_v52 = vrot.slane %v2677_v48, 7  ;;  %v706_v16 = vadd.f32 %v2733_v23, %v3371_v31  ;;  %v707_v51 = vadd.f32 %v2737_v2, %v3372_v5  ;;  %v1090_v24 = vmax.f32 %v1058_v38, 0.0 }
  0xb8   : > { %v1091_v29 = vmax.f32 %v1059_v3, 0.0  ;;  %v901_v12 = vadd.f32 %v870_v14, %v836_v61  ;;  %v740_v59 = vmul.f32 %v2745_v6, %v2337_v30  ;;  %v965_v45 = vadd.f32 %v934_v27, %v900_v18  ;;  %v3377_v3 = vld [vmem:[#allocation5_spill] sm:$0xff] }
  0xb9   : > { %v3374_v53 = vrot.slane %v3373_v33, 7  ;;  %v3375_v28 = vrot.slane %v2657_v47, 7  ;;  %v741_v2 = vmul.f32 %v2745_v6, %v2657_v47  ;;  %v2887_v0 = vadd.f32 %v2725_v34, %v2722_v10 }
  0xba   : > { %v1116_v43 = vpack.c.bf16 %v1091_v29, %v1090_v24  ;;  %v966_v30 = vadd.f32 %v935_v17, %v901_v12  ;;  %v1030_v56 = vadd.f32 %v999_v57, %v965_v45  ;;  %v772_v9 = vadd.f32 %v740_v59, %v706_v16  ;;  %v3379_v12 = vld [vmem:[#allocation15_spill] sm:$0xff]  ;;  %v3380_v45 = vld [vmem:[#allocation14_spill] sm:$0xff] }
  0xbb   : > { %v640_v46 = vsel %vm294_vm1, %v639_v52, %v3374_v53  ;;  %v641_v23 = vsel %vm294_vm1, %v3375_v28, %v639_v52  ;;  %v773_v14 = vadd.f32 %v741_v2, %v707_v51  ;;  %v776_v47 = vrot.slane %v2896_v49, 1 }
  0xbc   : > { %v642_v19 = vsel %vm259_vm0, %v641_v23, 0.0  ;;  %v2892_v50 = vmul.f32 %v2730_v39, %v640_v46  ;;  %1471 = vmatmul.msk.bf16.gmra.mxu1 %vm1162_vm4, %v1116_v43  ;;  %v1031_v54 = vadd.f32 %v1000_v55, %v966_v30  ;;  %v878_v34 = vmul.f32 %v2760_v21, %v640_v46  ;;  %v3381_v46 = vld [vmem:[#allocation22_spill] sm:$0xff]  ;;  %v3382_v23 = vld [vmem:[#allocation24_spill] sm:$0xff]  ;;  %v3383_v30 = vld [vmem:[#allocation69_spill] sm:$0xff] }
  0xbd   : > { %v877_v10 = vmul.f32 %v2760_v21, %v642_v19  ;;  %v1066_v60 = vadd.f32 %v2830_v11, %v1030_v56  ;;  %v843_v27 = vadd.f32 %v2752_v44, %v772_v9  ;;  %v844_v15 = vadd.f32 %v2755_v35, %v773_v14  ;;  %v3384_v56 = vld [vmem:[#allocation70_spill] sm:$0xff] }
  0xbe   : > { %v942_v37 = vmul.f32 %v2767_v20, %v2677_v48  ;;  %v1067_v17 = vadd.f32 %v2830_v11, %v1031_v54  ;;  %v3376_v57 = vrot.slane %v2677_v48, 1  ;;  %v3378_v61 = vrot.slane %v3377_v3, 1  ;;  %v1572_v3 = vld [vmem:[%s1758_s30 + $0x48] sm:$0xff] }
  0xbf   : > { %v943_v44 = vmul.f32 %v2896_v49, %v2767_v20  ;;  %v1098_v18 = vmax.f32 %v1066_v60, 0.0  ;;  %v2918_v35 = vmul.f32 %v2730_v39, %v642_v19  ;;  %v908_v31 = vadd.f32 %v877_v10, %v843_v27  ;;  %v3385_v10 = vld [vmem:[#allocation16_spill] sm:$0xff]  ;;  %v3386_v60 = vld [vmem:[#allocation13_spill] sm:$0xff] }
  0xc0   : > { %v777_v38 = vsel %vm514_vm3, %v3376_v57, %v776_v47  ;;  %v778_v55 = vsel %vm514_vm3, %v776_v47, %v3378_v61  ;;  %v1099_v16 = vmax.f32 %v1067_v17, 0.0  ;;  %v909_v51 = vadd.f32 %v878_v34, %v844_v15  ;;  %v1571_v57 = vld [vmem:[%s1758_s30 + $0x40] sm:$0xff] }
  0xc1   : > { %v2922_v52 = vsel %vm262_vm2, %v778_v55, 0.0  ;;  %v2925_v5 = vmul.f32 %v2702_v22, %v777_v38  ;;  %v1007_v4 = vmul.f32 %v2777_v1, %v777_v38  ;;  %v973_v24 = vadd.f32 %v942_v37, %v908_v31  ;;  %v3387_v61 = vld [vmem:[#allocation17_spill] sm:$0xff] }
  0xc2   : > { %v1008_v29 = vmul.f32 %v2777_v1, %v2922_v52  ;;  %v652_v59 = vmul.f32 %v2730_v39, %v3379_v12  ;;  %v653_v8 = vmul.f32 %v2730_v39, %v3380_v45  ;;  %v1120_v33 = vpack.c.bf16 %v1099_v16, %v1098_v18  ;;  %v1573_v12 = vld [vmem:[%s1758_s30 + $0x70] sm:$0xff]  ;;  %v1574_v45 = vld [vmem:[%s1758_s30 + $0x78] sm:$0xff] }
  0xc3   : > { %v974_v53 = vadd.f32 %v943_v44, %v909_v51  ;;  %v718_v28 = vmul.f32 %v3381_v46, %v2745_v6  ;;  %v719_v2 = vmul.f32 %v3382_v23, %v2745_v6  ;;  %v1038_v43 = vadd.f32 %v1007_v4, %v973_v24  ;;  %v3388_v44 = vld [vmem:[#allocation20_spill] sm:$0xff]  ;;  %v3389_v46 = vld [vmem:[#allocation11_spill] sm:$0xff] }
  0xc4   : > { %v684_v19 = vadd.f32 %v652_v59, %v3383_v30  ;;  %v685_v9 = vadd.f32 %v653_v8, %v3384_v56  ;;  %v789_v14 = vmul.f32 %v2702_v22, %v3355_v40  ;;  %1475 = vmatmul.msk.bf16.gmra.mxu2 %vm1162_vm4, %v1120_v33  ;;  %v790_v47 = vmul.f32 %v2702_v22, %v3356_v36  ;;  %v3391_v30 = vld [vmem:[#allocation38_spill] sm:$0xff] }
  0xc5   : > { %v1039_v54 = vadd.f32 %v1008_v29, %v974_v53  ;;  %v855_v34 = vmul.f32 %v2760_v21, %v3385_v10  ;;  %v856_v27 = vmul.f32 %v2760_v21, %v3386_v60  ;;  %v1074_v15 = vadd.f32 %v2830_v11, %v1038_v43  ;;  %v1576_v60 = vld [vmem:[%s1758_s30 + $0x88] sm:$0xff] }
  0xc6   : > { %v750_v37 = vadd.f32 %v718_v28, %v684_v19  ;;  %v751_v17 = vadd.f32 %v719_v2, %v685_v9  ;;  %v920_v40 = vmul.f32 %v1571_v57, %v2767_v20  ;;  %v921_v36 = vmul.f32 %v1572_v3, %v2767_v20  ;;  %v3390_v2 = vld [vmem:[#allocation9_spill] sm:$0xff] }
  0xc7   : > { %v1075_v38 = vadd.f32 %v2830_v11, %v1039_v54  ;;  %v985_v55 = vmul.f32 %v2777_v1, %v3387_v61  ;;  %v986_v18 = vmul.f32 %v2777_v1, %v3388_v44  ;;  %v1106_v31 = vmax.f32 %v1074_v15, 0.0  ;;  %v3392_v54 = vld [vmem:[#allocation36_spill] sm:$0xff]  ;;  %v3393_v15 = vld [vmem:[#allocation41_spill] sm:$0xff] }
  0xc8   : > { %v821_v16 = vadd.f32 %v789_v14, %v750_v37  ;;  %v822_v51 = vadd.f32 %v790_v47, %v751_v17  ;;  %v660_v4 = vmul.f32 %v2730_v39, %v3359_v25  ;;  %v661_v29 = vmul.f32 %v2730_v39, %v3360_v26 }
  0xc9   : > { %v1107_v24 = vmax.f32 %v1075_v38, 0.0  ;;  %v726_v59 = vmul.f32 %v1573_v12, %v2745_v6  ;;  %v727_v8 = vmul.f32 %v1574_v45, %v2745_v6  ;;  %v797_v23 = vmul.f32 %v2702_v22, %v3362_v63  ;;  %v3396_v12 = vld [vmem:[#allocation10_spill] sm:$0xff] }
  0xca   : > { %v886_v33 = vadd.f32 %v855_v34, %v821_v16  ;;  %v887_v53 = vadd.f32 %v856_v27, %v822_v51  ;;  %v692_v28 = vadd.f32 %v660_v4, %v3389_v46  ;;  %v693_v43 = vadd.f32 %v661_v29, %v3390_v2  ;;  %v1575_v34 = vld [vmem:[%s1758_s30 + $0x80] sm:$0xff] }
  0xcb   : > { %v1124_v25 = vpack.c.bf16 %v1107_v24, %v1106_v31  ;;  %v798_v26 = vmul.f32 %v2702_v22, %v3363_v41  ;;  %v863_v19 = vmul.f32 %v2760_v21, %v3391_v30  ;;  %v864_v47 = vmul.f32 %v2760_v21, %v3392_v54  ;;  %v1220_v31 = vpop.f32.mrf.mxu0  ;;  %v3395_v24 = vld [vmem:[#allocation28_spill] sm:$0xff] }
  0xcc   : > { %v951_v56 = vadd.f32 %v920_v40, %v886_v33  ;;  %v952_v9 = vadd.f32 %v921_v36, %v887_v53  ;;  %v758_v14 = vadd.f32 %v726_v59, %v692_v28  ;;  %v759_v10 = vadd.f32 %v727_v8, %v693_v43  ;;  %v3394_v40 = vld [vmem:[#allocation43_spill] sm:$0xff] }
  0xcd   : > { %1479 = vmatmul.msk.bf16.gmra.mxu3 %vm1162_vm4, %v1124_v25  ;;  %v928_v63 = vmul.f32 %v1575_v34, %v2767_v20  ;;  %v929_v27 = vmul.f32 %v1576_v60, %v2767_v20  ;;  %v993_v41 = vmul.f32 %v2777_v1, %v3393_v15  ;;  %v994_v38 = vmul.f32 %v2777_v1, %v3394_v40  ;;  %v3398_v25 = vld [vmem:[#allocation57_spill] sm:$0xff] }
  0xce   : > { %v1016_v37 = vadd.f32 %v985_v55, %v951_v56  ;;  %v1017_v17 = vadd.f32 %v986_v18, %v952_v9  ;;  %v829_v57 = vadd.f32 %v797_v23, %v758_v14  ;;  %v830_v3 = vadd.f32 %v798_v26, %v759_v10  ;;  %v1577_v56 = vld [vmem:[%s1758_s30 + $0xc8] sm:$0xff]  ;;  %v3402_v34 = vld [vmem:[#allocation21_spill] sm:$0xff]  ;;  %s1446_s30 = sshll.u32 %s215_s12, 8 }
  0xcf   : > { %v668_v36 = vmul.f32 %v2730_v39, %v3366_v7  ;;  %v669_v61 = vmul.f32 %v2730_v39, %v3367_v62  ;;  %v734_v44 = vmul.f32 %v2745_v6, %v2253_v32  ;;  %v735_v51 = vmul.f32 %v2745_v6, %v3368_v58  ;;  %v3397_v58 = vld [vmem:[#allocation59_spill] sm:$0xff]  ;;  %v3400_v14 = vld [vmem:[#allocation62_spill] sm:$0xff]  ;;  %v3022_v60 = vld [vmem:[%s3150_s4] ss:$0 sm:$0xff]  ;;  %s3045_s15 = scalar_lea.vmem [#allocation2], %s1446_s30 }
  0xd0   : > { %v1052_v16 = vadd.f32 %v2830_v11, %v1016_v37  ;;  %v1053_v55 = vadd.f32 %v2830_v11, %v1017_v17  ;;  %v894_v18 = vadd.f32 %v863_v19, %v829_v57  ;;  %v895_v4 = vadd.f32 %v864_v47, %v830_v3  ;;  %v3401_v47 = vld [vmem:[#allocation63_spill] sm:$0xff]  ;;  %s1377_s26 = sshll.u32 %s3045_s15, 4  ;;  %s1378_s26 = int_to_ptr.vmem [resolvable:$true] %s1377_s26 }
  0xd1   : > { %v700_v29 = vadd.f32 %v668_v36, %v3395_v24  ;;  %v701_v7 = vadd.f32 %v669_v61, %v3396_v12  ;;  %v805_v39 = vmul.f32 %v2702_v22, %v3369_v13  ;;  %v806_v45 = vmul.f32 %v2702_v22, %v3370_v42  ;;  %v3399_v13 = vld [vmem:[#allocation53_spill] sm:$0xff] }
  0xd2   : > { %v1084_v62 = vmax.f32 %v1052_v16, 0.0  ;;  %v1085_v32 = vmax.f32 %v1053_v55, 0.0  ;;  %v959_v59 = vadd.f32 %v928_v63, %v894_v18  ;;  %v960_v8 = vadd.f32 %v929_v27, %v895_v4 }
  0xd3   : > { %v766_v33 = vadd.f32 %v734_v44, %v700_v29  ;;  %v767_v53 = vadd.f32 %v735_v51, %v701_v7  ;;  %v871_v46 = vmul.f32 %v2760_v21, %v3397_v58  ;;  %v872_v2 = vmul.f32 %v2760_v21, %v3398_v25  ;;  %v1222_v44 = vpop.f32.mrf.mxu0 }
  0xd4   : > { %v1113_v28 = vpack.c.bf16 %v1085_v32, %v1084_v62  ;;  %v1024_v23 = vadd.f32 %v993_v41, %v959_v59  ;;  %v936_v43 = vmul.f32 %v2767_v20, %v3399_v13  ;;  %v1025_v26 = vadd.f32 %v994_v38, %v960_v8 }
  0xd5   : > { %v837_v30 = vadd.f32 %v805_v39, %v766_v33  ;;  %v838_v19 = vadd.f32 %v806_v45, %v767_v53  ;;  %v937_v42 = vmul.f32 %v1577_v56, %v2767_v20  ;;  %v1001_v54 = vmul.f32 %v2777_v1, %v3400_v14 }
  0xd6   : > { %1468 = vmatmul.msk.bf16.gmra.mxu0 %vm1162_vm4, %v1113_v28  ;;  %v1060_v9 = vadd.f32 %v2830_v11, %v1024_v23  ;;  %v1002_v10 = vmul.f32 %v2777_v1, %v3401_v47  ;;  %v708_v63 = vadd.f32 %v2918_v35, %v3402_v34  ;;  %v1061_v27 = vadd.f32 %v2830_v11, %v1025_v26 }
  0xd7   : > { %v902_v15 = vadd.f32 %v871_v46, %v837_v30  ;;  %v903_v41 = vadd.f32 %v872_v2, %v838_v19  ;;  %v709_v37 = vadd.f32 %v2892_v50, %v2887_v0  ;;  %v814_v17 = vmul.f32 %v2702_v22, %v2922_v52  ;;  %v1240_v52 = vpop.f32.mrf.mxu1 }
  0xd8   : > { %v1092_v57 = vmax.f32 %v1060_v9, 0.0  ;;  %v742_v40 = vmul.f32 %v2745_v6, %v2677_v48  ;;  %v743_v35 = vmul.f32 %v2896_v49, %v2745_v6  ;;  %v1093_v38 = vmax.f32 %v1061_v27, 0.0 }
  0xd9   : > { %v967_v3 = vadd.f32 %v936_v43, %v902_v15  ;;  %v968_v36 = vadd.f32 %v937_v42, %v903_v41  ;;  %v879_v61 = vmul.f32 0.0, %v2760_v21  ;;  %v944_v50 = vmul.f32 0.0, %v2767_v20 }
  0xda   : > { %v774_v16 = vadd.f32 %v742_v40, %v708_v63  ;;  %v775_v0 = vadd.f32 %v743_v35, %v709_v37  ;;  %v1221_v22 = vadd.f32 %v3022_v60, %v1220_v31  ;;  %v1117_v55 = vpack.c.bf16 %v1093_v38, %v1092_v57 }
  0xdb   : > { %v1032_v48 = vadd.f32 %v1001_v54, %v967_v3  ;;  %v1033_v18 = vadd.f32 %v1002_v10, %v968_v36  ;;  %v1241_v6 = vadd.f32 %v3022_v60, %v1240_v52  ;;  %v1223_v24 = vadd.f32 %v3022_v60, %v1222_v44 }
  0xdc   : > { %v845_v49 = vadd.f32 %v2925_v5, %v774_v16  ;;  %v846_v51 = vadd.f32 %v814_v17, %v775_v0  ;;  %v1300_v4 = vmax.f32 %v1221_v22, 0.0  ;;  %1472 = vmatmul.msk.bf16.gmra.mxu1 %vm1162_vm4, %v1117_v55  ;;  %v1009_v7 = vmul.f32 0.0, %v2777_v1 }
  0xdd   : > { %v1068_v21 = vadd.f32 %v2830_v11, %v1032_v48  ;;  %v1069_v20 = vadd.f32 %v2830_v11, %v1033_v18  ;;  %v1308_v29 = vmax.f32 %v1241_v6, 0.0  ;;  %v1301_v5 = vmax.f32 %v1223_v24, 0.0 }
  0xde   : > { %v910_v31 = vadd.f32 %v879_v61, %v845_v49  ;;  %v911_v12 = vadd.f32 %v879_v61, %v846_v51  ;;  %1332 = vst [vmem:[%s3045_s15] sm:$0xff] %v1300_v4 }
  0xdf   : > { %v1100_v39 = vmax.f32 %v1068_v21, 0.0  ;;  %v1101_v62 = vmax.f32 %v1069_v20, 0.0  ;;  %1340 = vst [vmem:[%s3045_s15 + $0x40] sm:$0xff] %v1308_v29  ;;  %v1242_v58 = vpop.f32.mrf.mxu1 }
  0xe0   : > { %v975_v32 = vadd.f32 %v944_v50, %v910_v31  ;;  %v976_v59 = vadd.f32 %v944_v50, %v911_v12  ;;  %1333 = vst [vmem:[%s3045_s15 + $0x8] sm:$0xff] %v1301_v5  ;;  %v1243_v23 = vadd.f32 %v3022_v60, %v1242_v58 }
  0xe1   : > { %v1121_v45 = vpack.c.bf16 %v1101_v62, %v1100_v39 }
  0xe2   : > { %v1040_v8 = vadd.f32 %v1009_v7, %v975_v32  ;;  %v1041_v33 = vadd.f32 %v1009_v7, %v976_v59  ;;  %v1309_v2 = vmax.f32 %v1243_v23, 0.0 }
  0xe3   : > { %1476 = vmatmul.msk.bf16.gmra.mxu2 %vm1162_vm4, %v1121_v45 }
  0xe4   : > { %v1076_v1 = vadd.f32 %v2830_v11, %v1040_v8  ;;  %v1077_v53 = vadd.f32 %v2830_v11, %v1041_v33  ;;  %1341 = vst [vmem:[%s3045_s15 + $0x48] sm:$0xff] %v1309_v2 }
  0xe5   : > { %v1260_v13 = vpop.f32.mrf.mxu2 }
  0xe6   : > { %v1108_v46 = vmax.f32 %v1076_v1, 0.0  ;;  %v1109_v28 = vmax.f32 %v1077_v53, 0.0  ;;  %v1261_v43 = vadd.f32 %v3022_v60, %v1260_v13 }
  0xe8   : > { %v1125_v25 = vpack.c.bf16 %v1109_v28, %v1108_v46  ;;  %v1316_v26 = vmax.f32 %v1261_v43, 0.0 }
  0xea   : > { %1480 = vmatmul.msk.bf16.gmra.mxu3 %vm1162_vm4, %v1125_v25  ;;  %1348 = vst [vmem:[%s3045_s15 + $0x80] sm:$0xff] %v1316_v26 }
  0xed   : > { %v1262_v11 = vpop.f32.mrf.mxu2 }
  0xee   : > { %v1263_v30 = vadd.f32 %v3022_v60, %v1262_v11 }
  0xf0   : > { %v1317_v19 = vmax.f32 %v1263_v30, 0.0 }
  0xf2   : > { %1349 = vst [vmem:[%s3045_s15 + $0x88] sm:$0xff] %v1317_v19 }
  0xfc   : > { %v1280_v56 = vpop.f32.mrf.mxu3 }
  0xfd   : > { %v1281_v42 = vadd.f32 %v3022_v60, %v1280_v56 }
  0xff   : > { %v1324_v9 = vmax.f32 %v1281_v42, 0.0 }
 0x101   : > { %1356 = vst [vmem:[%s3045_s15 + $0xc0] sm:$0xff] %v1324_v9 }
 0x104   : > { %v1225_v14 = vpop.f32.mrf.mxu0  ;;  %v1282_v47 = vpop.f32.mrf.mxu3 }
 0x105   : > { %v1226_v54 = vadd.f32 %v3022_v60, %v1225_v14  ;;  %v1283_v10 = vadd.f32 %v3022_v60, %v1282_v47 }
 0x107   : > { %v1302_v34 = vmax.f32 %v1226_v54, 0.0  ;;  %v1325_v63 = vmax.f32 %v1283_v10, 0.0 }
 0x109   : > { %1334 = vst [vmem:[%s3045_s15 + $0x10] sm:$0xff] %v1302_v34 }
 0x10a   : > { %1357 = vst [vmem:[%s3045_s15 + $0xc8] sm:$0xff] %v1325_v63 }
 0x10c   : > { %v1227_v27 = vpop.f32.mrf.mxu0 }
 0x10d   : > { %v1228_v15 = vadd.f32 %v3022_v60, %v1227_v27 }
 0x10f   : > { %v1303_v41 = vmax.f32 %v1228_v15, 0.0 }
 0x111   : > { %1335 = vst [vmem:[%s3045_s15 + $0x18] sm:$0xff] %v1303_v41 }
 0x113   : > { %v1245_v37 = vpop.f32.mrf.mxu1 }
 0x114   : > { %v1246_v17 = vadd.f32 %v3022_v60, %v1245_v37 }
 0x116   : > { %v1310_v57 = vmax.f32 %v1246_v17, 0.0 }
 0x118   : > { %1342 = vst [vmem:[%s3045_s15 + $0x50] sm:$0xff] %v1310_v57 }
 0x11b   : > { %v1247_v40 = vpop.f32.mrf.mxu1 }
 0x11c   : > { %v1248_v35 = vadd.f32 %v3022_v60, %v1247_v40 }
 0x11e   : > { %v1311_v38 = vmax.f32 %v1248_v35, 0.0 }
 0x120   : > { %1343 = vst [vmem:[%s3045_s15 + $0x58] sm:$0xff] %v1311_v38 }
 0x126   : > { %v1265_v3 = vpop.f32.mrf.mxu2 }
 0x127   : > { %v1266_v36 = vadd.f32 %v3022_v60, %v1265_v3 }
 0x129   : > { %v1318_v61 = vmax.f32 %v1266_v36, 0.0 }
 0x12b   : > { %1350 = vst [vmem:[%s3045_s15 + $0x90] sm:$0xff] %v1318_v61 }
 0x12e   : > { %v1267_v44 = vpop.f32.mrf.mxu2 }
 0x12f   : > { %v1268_v16 = vadd.f32 %v3022_v60, %v1267_v44 }
 0x131   : > { %v1319_v0 = vmax.f32 %v1268_v16, 0.0 }
 0x133   : > { %1351 = vst [vmem:[%s3045_s15 + $0x98] sm:$0xff] %v1319_v0 }
 0x134   : > { %v1230_v50 = vpop.f32.mrf.mxu0 }
 0x135   : > { %v1231_v22 = vadd.f32 %v3022_v60, %v1230_v50 }
 0x136   : > { %v1285_v52 = vpop.f32.mrf.mxu3 }
 0x137   : > { %v1286_v55 = vadd.f32 %v3022_v60, %v1285_v52  ;;  %v1304_v48 = vmax.f32 %v1231_v22, 0.0 }
 0x139   : > { %v1326_v18 = vmax.f32 %v1286_v55, 0.0  ;;  %1336 = vst [vmem:[%s3045_s15 + $0x20] sm:$0xff] %v1304_v48  ;;  %v1250_v6 = vpop.f32.mrf.mxu1 }
 0x13a   : > { %v1251_v49 = vadd.f32 %v3022_v60, %v1250_v6 }
 0x13b   : > { %1358 = vst [vmem:[%s3045_s15 + $0xd0] sm:$0xff] %v1326_v18 }
 0x13c   : > { %v1312_v51 = vmax.f32 %v1251_v49, 0.0  ;;  %v1232_v4 = vpop.f32.mrf.mxu0 }
 0x13d   : > { %v1233_v24 = vadd.f32 %v3022_v60, %v1232_v4 }
 0x13e   : > { %v1287_v21 = vpop.f32.mrf.mxu3  ;;  %1344 = vst [vmem:[%s3045_s15 + $0x60] sm:$0xff] %v1312_v51 }
 0x13f   : > { %v1288_v20 = vadd.f32 %v3022_v60, %v1287_v21  ;;  %v1305_v29 = vmax.f32 %v1233_v24, 0.0 }
 0x141   : > { %v1327_v31 = vmax.f32 %v1288_v20, 0.0  ;;  %1337 = vst [vmem:[%s3045_s15 + $0x28] sm:$0xff] %v1305_v29  ;;  %v1252_v12 = vpop.f32.mrf.mxu1 }
 0x142   : > { %v1253_v7 = vadd.f32 %v3022_v60, %v1252_v12 }
 0x143   : > { %1359 = vst [vmem:[%s3045_s15 + $0xd8] sm:$0xff] %v1327_v31 }
 0x144   : > { %v1313_v5 = vmax.f32 %v1253_v7, 0.0 }
 0x146   : > { %1345 = vst [vmem:[%s3045_s15 + $0x68] sm:$0xff] %v1313_v5 }
 0x147   : > { %v1270_v39 = vpop.f32.mrf.mxu2 }
 0x148   : > { %v1271_v62 = vadd.f32 %v3022_v60, %v1270_v39 }
 0x14a   : > { %v1320_v32 = vmax.f32 %v1271_v62, 0.0 }
 0x14c   : > { %1352 = vst [vmem:[%s3045_s15 + $0xa0] sm:$0xff] %v1320_v32 }
 0x14f   : > { %v1272_v45 = vpop.f32.mrf.mxu2 }
 0x150   : > { %v1290_v59 = vpop.f32.mrf.mxu3  ;;  %v1273_v33 = vadd.f32 %v3022_v60, %v1272_v45 }
 0x151   : > { %v1291_v8 = vadd.f32 %v3022_v60, %v1290_v59 }
 0x152   : > { %v1321_v58 = vmax.f32 %v1273_v33, 0.0 }
 0x153   : > { %v1328_v1 = vmax.f32 %v1291_v8, 0.0  ;;  %v1235_v53 = vpop.f32.mrf.mxu0 }
 0x154   : > { %v1236_v46 = vadd.f32 %v3022_v60, %v1235_v53  ;;  %1353 = vst [vmem:[%s3045_s15 + $0xa8] sm:$0xff] %v1321_v58 }
 0x155   : > { %1360 = vst [vmem:[%s3045_s15 + $0xe0] sm:$0xff] %v1328_v1 }
 0x156   : > { %v1306_v28 = vmax.f32 %v1236_v46, 0.0 }
 0x158   : > { %1338 = vst [vmem:[%s3045_s15 + $0x30] sm:$0xff] %v1306_v28  ;;  %v1292_v23 = vpop.f32.mrf.mxu3 }
 0x159   : > { %v1293_v25 = vadd.f32 %v3022_v60, %v1292_v23  ;;  %v1255_v2 = vpop.f32.mrf.mxu1 }
 0x15a   : > { %v1256_v43 = vadd.f32 %v3022_v60, %v1255_v2 }
 0x15b   : > { %v1329_v13 = vmax.f32 %v1293_v25, 0.0  ;;  %v1237_v26 = vpop.f32.mrf.mxu0 }
 0x15c   : > { %v1238_v11 = vadd.f32 %v3022_v60, %v1237_v26  ;;  %v1314_v30 = vmax.f32 %v1256_v43, 0.0 }
 0x15d   : > { %1361 = vst [vmem:[%s3045_s15 + $0xe8] sm:$0xff] %v1329_v13 }
 0x15e   : > { %v1307_v19 = vmax.f32 %v1238_v11, 0.0  ;;  %1346 = vst [vmem:[%s3045_s15 + $0x70] sm:$0xff] %v1314_v30 }
 0x160   : > { %1339 = vst [vmem:[%s3045_s15 + $0x38] sm:$0xff] %v1307_v19 }
 0x161   : > { %v1257_v56 = vpop.f32.mrf.mxu1 }
 0x162   : > { %v1258_v42 = vadd.f32 %v3022_v60, %v1257_v56 }
 0x164   : > { %v1315_v9 = vmax.f32 %v1258_v42, 0.0 }
 0x166   : > { %v1275_v14 = vpop.f32.mrf.mxu2  ;;  %1347 = vst [vmem:[%s3045_s15 + $0x78] sm:$0xff] %v1315_v9 }
 0x167   : > { %v1276_v54 = vadd.f32 %v3022_v60, %v1275_v14 }
 0x169   : > { %v1322_v47 = vmax.f32 %v1276_v54, 0.0 }
 0x16b   : > { %1354 = vst [vmem:[%s3045_s15 + $0xb0] sm:$0xff] %v1322_v47 }
 0x16d   : > { %v1295_v10 = vpop.f32.mrf.mxu3 }
 0x16e   : > { %v1296_v34 = vadd.f32 %v3022_v60, %v1295_v10  ;;  %v1277_v63 = vpop.f32.mrf.mxu2 }
 0x16f   : > { %v1278_v27 = vadd.f32 %v3022_v60, %v1277_v63 }
 0x170   : > { %v1330_v15 = vmax.f32 %v1296_v34, 0.0 }
 0x171   : > { %v1323_v41 = vmax.f32 %v1278_v27, 0.0 }
 0x172   : > { %1362 = vst [vmem:[%s3045_s15 + $0xf0] sm:$0xff] %v1330_v15 }
 0x173   : > { %1355 = vst [vmem:[%s3045_s15 + $0xb8] sm:$0xff] %v1323_v41 }
 0x175   : > { %v1297_v37 = vpop.f32.mrf.mxu3 }
 0x176   : > { %v1298_v17 = vadd.f32 %v3022_v60, %v1297_v37 }
 0x178   : > { %v1331_v57 = vmax.f32 %v1298_v17, 0.0 }
 0x17a   : > { %1363 = vst [vmem:[%s3045_s15 + $0xf8] sm:$0xff] %v1331_v57 }
 0x17b   : > { %1605 = shalt.err (!%p1602_p3)
}
 0x17c   : > { %s1642_s12 = smov 128   ;;  %s1643_s30 = smov 8  }
 0x17d   : > { %1504 = dma.vmem_to_hbm [thread:$0]  (%p1712_p5), %s1378_s26, 4096, %s1380_s6, %s1365_s22, %s1642_s12, %s1642_s12, %s1643_s30  }
 0x17e PF: > { %p1510_p4 = scmp.ge.s32.totalorder %s1640_s21, 2  ;;  %s1394_s15 = sand.u32 1, %s1628_s18  }
 0x17f   : > { %s1395_s16 = scalar_lea.sflag [#allocation3], %s1394_s15 }
 0x180   : > { %p1507_p7 = pnand %p1510_p4, %p1716_p6 }
 0x182   : > { %p1508_p8 = pneg %p1507_p7 }
 0x184   : > { %1623 = dma.done.wait (%p1508_p8), %s1395_s16, 4096  }
 0x185   : > { %1625 = vsyncadd (%p1508_p8), %s1395_s16, 4294963200  ;;  %p15_p9 = scmp.ge.s32.totalorder %s1699_s24, 4   ;;  %s3403_s18 = smov %s1632_s19 }
 0x186   : > { %s3404_s19 = smov %s1636_s20  ;;  %s3405_s20 = smov %s1710_s27 }
 0x187   : > { %s3406_s21 = smov %s1699_s24  ;;  %17 = sbr.rel (!%p15_p9) target bundleno = 3 (0x3), region = 75 }
 0x18c   :  { %1401 = vsyncpa [#allocation3], 1 }
 0x18d   :  { %1403 = vsyncpa [#allocation3 + $0x1], 1 }

</bundles_post_ra>
